<compile_context>
chip_gen: v7x
topology: tpu7x:2x2x1
jax: 0.10.0
libtpu: 0.0.40
codegen_flags: <defaults>
</compile_context>

<pallas_src>
import functools

import jax
import jax.numpy as jnp
import numpy as np
from jax import lax
from jax.experimental import pallas as pl
from jax.experimental.pallas import tpu as pltpu


def _bn1_stats_kernel(x_ref, o_ref):
    """Single-pass per-image, per-channel sum and sum-of-squares of x.

    x_ref: (Nb, Cin, HW)   o_ref: (Nb, Cin, 2)  [..., 0]=sum, [..., 1]=sumsq
    """
    for n in range(x_ref.shape[0]):
        xn = x_ref[n]                                           # (Cin, HW)
        o_ref[n, :, 0:1] = jnp.sum(xn, axis=1, keepdims=True)
        o_ref[n, :, 1:2] = jnp.sum(xn * xn, axis=1, keepdims=True)


def _bn2_stats_kernel(x_ref, s1_ref, b1_ref, w1_ref, o_ref):
    """BN1 (folded affine) + ReLU + 1x1 conv; emits only BN2 partial statistics.

    The bottleneck activation t stays in VMEM/vregs -- no HBM round trip.
    x_ref: (Nb, Cin, HW), s1/b1: (Cin, 1), w1: (Cb, Cin), o_ref: (Nb, Cb, 2)
    """
    for n in range(x_ref.shape[0]):
        a = jnp.maximum(x_ref[n] * s1_ref[...] + b1_ref[...], 0.0)
        t = jnp.dot(w1_ref[...], a.astype(w1_ref.dtype),
                    preferred_element_type=jnp.float32)         # (Cb, HW) on MXU
        o_ref[n, :, 0:1] = jnp.sum(t, axis=1, keepdims=True)
        o_ref[n, :, 1:2] = jnp.sum(t * t, axis=1, keepdims=True)


def _bottleneck_out_kernel(x_ref, s1_ref, b1_ref, w1_ref, s2_ref, b2_ref,
                           w2_ref, mask_ref, o_ref, stage_ref, *, W):
    """Recompute BN1+ReLU+1x1, then BN2+ReLU+3x3 conv + fused concat with x.

    The 3x3 conv is a single (G, 9*Cb) x (9*Cb, HW) matmul: the 9 taps are
    staged into a VMEM scratch as lane-rolled copies of the activation
    (pltpu.roll on the flattened H*W axis), zeroed at image borders with
    precomputed per-tap masks (no per-step iota/mod work).

    x_ref:    (Nb, Cin, HW)
    s1/b1:    (Cin, 1)    folded BN1 scale/shift
    w1_ref:   (Cb, Cin)   1x1 conv weight
    s2/b2:    (Cb, 1)     folded BN2 scale/shift
    w2_ref:   (G, 9*Cb)   3x3 weight, tap-major: [:, tap*Cb + c] = W2[:, c, i, j]
    mask_ref: (9, HW)     1.0 where tap (i, j) reads an in-bounds source pixel
    o_ref:    (Nb, Cin+G, HW)
    stage_ref:(9*Cb, HW)  VMEM scratch holding the shifted+masked tap copies
    """
    Cin = x_ref.shape[1]
    HW = x_ref.shape[2]
    Cb = s2_ref.shape[0]
    G = w2_ref.shape[0]
    for n in range(x_ref.shape[0]):
        x = x_ref[n]                                            # (Cin, HW)
        a1 = jnp.maximum(x * s1_ref[...] + b1_ref[...], 0.0)    # BN1 + ReLU (VPU)
        t = jnp.dot(w1_ref[...], a1.astype(w1_ref.dtype),
                    preferred_element_type=jnp.float32)         # (Cb, HW) on MXU
        a2 = jnp.maximum(t * s2_ref[...] + b2_ref[...], 0.0)    # BN2 + ReLU (VPU)

        for tap in range(9):
            i, j = divmod(tap, 3)
            d = (i - 1) * W + (j - 1)       # flattened source offset of this tap
            if d == 0:                      # centre tap: no shift, no mask
                v = a2
            else:
                # want v[:, k] = a2[:, k + d]  ->  roll by -d (jnp.roll semantics),
                # then zero the positions whose source falls outside the image
                # (this also kills any circular wrap-around from the roll).
                v = pltpu.roll(a2, shift=(-d) % HW, axis=1) * mask_ref[tap:tap + 1, :]
            stage_ref[tap * Cb:(tap + 1) * Cb, :] = v.astype(stage_ref.dtype)

        y = jnp.dot(w2_ref[...], stage_ref[...],
                    preferred_element_type=jnp.float32)         # (G, HW), K = 9*Cb
        # Fused torch.cat([x, y], dim=1).  (Assumes Cin % 8 == 0 so the second
        # store starts on a sublane boundary -- true for DenseNet channel counts.)
        o_ref[n, :Cin, :] = x
        o_ref[n, Cin:Cin + G, :] = y.astype(o_ref.dtype)


@functools.partial(jax.jit, static_argnames=("images_per_block", "use_bf16_matmul"))
def bottleneck_forward(x, gamma1, beta1, w1, gamma2, beta2, w2, eps=1e-5, *,
                       images_per_block=1, use_bf16_matmul=False):
    """DenseNet Bottleneck forward (training-mode BatchNorm).

    x: (N, Cin, H, W) NCHW; w1: (Cb, Cin); w2: (G, Cb, 3, 3) OIHW.
    Returns (N, Cin + G, H, W).

    images_per_block : images processed per grid step (amortizes the ~0.35us
        per-step overhead at larger N; keep N/images_per_block >= 2 on v7x so
        both TensorCores get work from the 'parallel' batch axis).
    use_bf16_matmul  : cast matmul operands (only) to bf16, accumulation stays
        f32 -- worthwhile on v6e/v7x, skip on v5e.
    """
    N, Cin, H, W = x.shape
    Cb = w1.shape[0]
    G = w2.shape[0]
    HW = H * W
    Nb = images_per_block
    assert N % Nb == 0, "images_per_block must divide the batch size"
    grid = (N // Nb,)
    mm_dtype = jnp.bfloat16 if use_bf16_matmul else jnp.float32

    # NCHW -> (N, C, H*W): contiguous reshape, no data movement.
    xf = x.astype(jnp.float32).reshape(N, Cin, HW)

    cp = pltpu.CompilerParams(
        dimension_semantics=("parallel",),        # megacore-shard the batch (v7x)
        vmem_limit_bytes=32 * 1024 * 1024,        # explicit budget (v7x: 64 MiB phys)
    )
    # TODO(synk): for real DenseNet sizes (HW = 56^2, Cin up to ~1k) add an HW
    # grid axis so double-buffered blocks stay inside v7x's smaller VMEM.

    # ---- Pass A: BN1 batch statistics in a single read of x -------------------
    xstats = pl.pallas_call(
        _bn1_stats_kernel,
        grid=grid,
        in_specs=[pl.BlockSpec((Nb, Cin, HW), lambda b: (b, 0, 0))],
        out_specs=pl.BlockSpec((Nb, Cin, 2), lambda b: (b, 0, 0)),
        out_shape=jax.ShapeDtypeStruct((N, Cin, 2), jnp.float32),
        compiler_params=cp,
    )(xf)

    cnt = float(N * HW)
    mean1 = jnp.sum(xstats[:, :, 0], axis=0) / cnt
    # One-pass biased variance (matches nn.BatchNorm2d training stats at rtol 1e-3;
    # switch to centered partials if tolerances ever tighten).
    var1 = jnp.sum(xstats[:, :, 1], axis=0) / cnt - mean1 * mean1
    scale1 = gamma1.astype(jnp.float32) / jnp.sqrt(var1 + eps)
    shift1 = beta1.astype(jnp.float32) - mean1 * scale1
    w1_mm = w1.astype(mm_dtype).reshape(Cb, Cin)

    # ---- Pass B: BN2 batch statistics (t never written to HBM) ----------------
    tstats = pl.pallas_call(
        _bn2_stats_kernel,
        grid=grid,
        in_specs=[
            pl.BlockSpec((Nb, Cin, HW), lambda b: (b, 0, 0)),
            pl.BlockSpec((Cin, 1), lambda b: (0, 0)),
            pl.BlockSpec((Cin, 1), lambda b: (0, 0)),
            pl.BlockSpec((Cb, Cin), lambda b: (0, 0)),
        ],
        out_specs=pl.BlockSpec((Nb, Cb, 2), lambda b: (b, 0, 0)),
        out_shape=jax.ShapeDtypeStruct((N, Cb, 2), jnp.float32),
        compiler_params=cp,
    )(xf, scale1.reshape(Cin, 1), shift1.reshape(Cin, 1), w1_mm)

    mean2 = jnp.sum(tstats[:, :, 0], axis=0) / cnt
    var2 = jnp.sum(tstats[:, :, 1], axis=0) / cnt - mean2 * mean2
    scale2 = gamma2.astype(jnp.float32) / jnp.sqrt(var2 + eps)
    shift2 = beta2.astype(jnp.float32) - mean2 * scale2

    # 3x3 weight packed tap-major: (G, 9*Cb), column tap*Cb + c == W2[:, c, i, j].
    w2_packed = jnp.transpose(w2.astype(jnp.float32), (0, 2, 3, 1)).reshape(G, 9 * Cb)
    w2_packed = w2_packed.astype(mm_dtype)

    # Per-tap validity masks over flattened spatial positions, built once here so
    # the kernel carries no per-step iota / mod / compare work.
    kk = jnp.arange(HW, dtype=jnp.int32)
    row, col = kk // W, kk % W
    tap_masks = []
    for i in range(3):
        for j in range(3):
            m = jnp.ones((HW,), dtype=jnp.bool_)
            if i == 0:
                m = m & (row > 0)
            if i == 2:
                m = m & (row < H - 1)
            if j == 0:
                m = m & (col > 0)
            if j == 2:
                m = m & (col < W - 1)
            tap_masks.append(m)
    tap_mask = jnp.stack(tap_masks, axis=0).astype(jnp.float32)     # (9, HW)

    # ---- Pass C: full forward + fused concat (single K=9*Cb MXU matmul) -------
    kernel_c = functools.partial(_bottleneck_out_kernel, W=W)
    out_flat = pl.pallas_call(
        kernel_c,
        grid=grid,
        in_specs=[
            pl.BlockSpec((Nb, Cin, HW), lambda b: (b, 0, 0)),
            pl.BlockSpec((Cin, 1), lambda b: (0, 0)),
            pl.BlockSpec((Cin, 1), lambda b: (0, 0)),
            pl.BlockSpec((Cb, Cin), lambda b: (0, 0)),
            pl.BlockSpec((Cb, 1), lambda b: (0, 0)),
            pl.BlockSpec((Cb, 1), lambda b: (0, 0)),
            pl.BlockSpec((G, 9 * Cb), lambda b: (0, 0)),
            pl.BlockSpec((9, HW), lambda b: (0, 0)),
        ],
        out_specs=pl.BlockSpec((Nb, Cin + G, HW), lambda b: (b, 0, 0)),
        out_shape=jax.ShapeDtypeStruct((N, Cin + G, HW), jnp.float32),
        scratch_shapes=[pltpu.VMEM((9 * Cb, HW), mm_dtype)],
        compiler_params=cp,
    )(xf, scale1.reshape(Cin, 1), shift1.reshape(Cin, 1), w1_mm,
      scale2.reshape(Cb, 1), shift2.reshape(Cb, 1), w2_packed, tap_mask)

    return out_flat.reshape(N, Cin + G, H, W)       # free reshape back to NCHW


def bottleneck_reference(x, gamma1, beta1, w1, gamma2, beta2, w2, eps=1e-5):
    """Pure-JAX reference matching the PyTorch forward (training-mode BN)."""
    xf = x.astype(jnp.float32)
    m1 = xf.mean(axis=(0, 2, 3), keepdims=True)
    v1 = xf.var(axis=(0, 2, 3), keepdims=True)
    a1 = jnp.maximum((xf - m1) / jnp.sqrt(v1 + eps) * gamma1.reshape(1, -1, 1, 1)
                     + beta1.reshape(1, -1, 1, 1), 0.0)
    t = jnp.einsum('oc,nchw->nohw', w1, a1, precision=lax.Precision.HIGHEST)
    m2 = t.mean(axis=(0, 2, 3), keepdims=True)
    v2 = t.var(axis=(0, 2, 3), keepdims=True)
    a2 = jnp.maximum((t - m2) / jnp.sqrt(v2 + eps) * gamma2.reshape(1, -1, 1, 1)
                     + beta2.reshape(1, -1, 1, 1), 0.0)
    y = lax.conv_general_dilated(a2, w2, window_strides=(1, 1),
                                 padding=((1, 1), (1, 1)),
                                 dimension_numbers=('NCHW', 'OIHW', 'NCHW'),
                                 precision=lax.Precision.HIGHEST)
    return jnp.concatenate([xf, y], axis=1)


if __name__ == "__main__":
    in_channels, growth_rate = 16, 8
    Cb = 4 * growth_rate                       # bottleneck channels = 32
    N, H, W = 2, 16, 16

    key = jax.random.PRNGKey(0)
    kx, kg1, kb1, kw1, kg2, kb2, kw2 = jax.random.split(key, 7)
    x = jax.random.normal(kx, (N, in_channels, H, W), dtype=jnp.float32)
    gamma1 = 1.0 + 0.1 * jax.random.normal(kg1, (in_channels,), dtype=jnp.float32)
    beta1 = 0.1 * jax.random.normal(kb1, (in_channels,), dtype=jnp.float32)
    gamma2 = 1.0 + 0.1 * jax.random.normal(kg2, (Cb,), dtype=jnp.float32)
    beta2 = 0.1 * jax.random.normal(kb2, (Cb,), dtype=jnp.float32)
    w1 = jax.random.normal(kw1, (Cb, in_channels), dtype=jnp.float32) / np.sqrt(in_channels)
    w2 = jax.random.normal(kw2, (growth_rate, Cb, 3, 3), dtype=jnp.float32) / np.sqrt(9 * Cb)

    ref = bottleneck_reference(x, gamma1, beta1, w1, gamma2, beta2, w2)

    # f32 matmuls, one image per grid step (grid of 2 keeps both v7x cores busy).
    out = bottleneck_forward(x, gamma1, beta1, w1, gamma2, beta2, w2)
    out = jax.block_until_ready(out)
    assert out.shape == (N, in_channels + growth_rate, H, W)
    np.testing.assert_allclose(np.asarray(out), np.asarray(ref), rtol=1e-3, atol=1e-3)

    # Batched grid blocks (amortizes per-step overhead at larger N).
    out_b = bottleneck_forward(x, gamma1, beta1, w1, gamma2, beta2, w2,
                               images_per_block=2)
    out_b = jax.block_until_ready(out_b)
    np.testing.assert_allclose(np.asarray(out_b), np.asarray(ref), rtol=1e-3, atol=1e-3)

    # bf16 matmul operands (the v6e/v7x option); accumulation stays f32.
    out_h = bottleneck_forward(x, gamma1, beta1, w1, gamma2, beta2, w2,
                               use_bf16_matmul=True)
    out_h = jax.block_until_ready(out_h)
    np.testing.assert_allclose(np.asarray(out_h), np.asarray(ref), rtol=5e-2, atol=5e-2)

    print("KERNEL_OK")
</pallas_src>

<mosaic_0001>
module attributes {stable_mosaic.version = 11 : i64} {
  func.func @_bn1_stats_kernel(%arg0: i32, %arg1: memref<1x16x256xf32, #tpu.memory_space<vmem>>, %arg2: memref<1x16x2xf32, #tpu.memory_space<vmem>>) attributes {dimension_semantics = [#tpu.dimension_semantics<parallel>], iteration_bounds = array<i64: 2>, scalar_prefetch = 0 : i64, scratch_operands = 0 : i64, tpu.core_type = #tpu.core_type<tc>, window_params = [{transform_indices = @transform_0, window_bounds = array<i64: 1, 16, 256>}, {transform_indices = @transform_1, window_bounds = array<i64: 1, 16, 2>}]} {
    %c0 = arith.constant 0 : index
    %c0_0 = arith.constant 0 : index
    %c0_1 = arith.constant 0 : index
    %0 = vector.load %arg1[%c0, %c0_0, %c0_1] : memref<1x16x256xf32, #tpu.memory_space<vmem>>, vector<1x16x256xf32>
    %1 = vector.shape_cast %0 : vector<1x16x256xf32> to vector<16x256xf32>
    %cst = arith.constant dense<0.000000e+00> : vector<16xf32>
    %2 = vector.multi_reduction <add>, %1, %cst [1] : vector<16x256xf32> to vector<16xf32>
    %3 = vector.shape_cast %2 : vector<16xf32> to vector<16x1xf32>
    %c0_2 = arith.constant 0 : index
    %c0_3 = arith.constant 0 : index
    %c0_4 = arith.constant 0 : index
    %4 = vector.load %arg2[%c0_2, %c0_3, %c0_4] : memref<1x16x2xf32, #tpu.memory_space<vmem>>, vector<1x16x1xf32>
    %5 = vector.shape_cast %4 : vector<1x16x1xf32> to vector<16x1xf32>
    %6 = vector.shape_cast %3 : vector<16x1xf32> to vector<1x16x1xf32>
    tpu.vector_store %arg2[%c0_2, %c0_3, %c0_4], %6 {strides = array<i32>} : memref<1x16x2xf32, #tpu.memory_space<vmem>>, vector<1x16x1xf32>,
    %7 = arith.mulf %1, %1 : vector<16x256xf32>
    %cst_5 = arith.constant dense<0.000000e+00> : vector<16xf32>
    %8 = vector.multi_reduction <add>, %7, %cst_5 [1] : vector<16x256xf32> to vector<16xf32>
    %9 = vector.shape_cast %8 : vector<16xf32> to vector<16x1xf32>
    %c0_6 = arith.constant 0 : index
    %c0_7 = arith.constant 0 : index
    %c1 = arith.constant 1 : index
    %10 = vector.load %arg2[%c0_6, %c0_7, %c1] : memref<1x16x2xf32, #tpu.memory_space<vmem>>, vector<1x16x1xf32>
    %11 = vector.shape_cast %10 : vector<1x16x1xf32> to vector<16x1xf32>
    %12 = vector.shape_cast %9 : vector<16x1xf32> to vector<1x16x1xf32>
    tpu.vector_store %arg2[%c0_6, %c0_7, %c1], %12 {strides = array<i32>} : memref<1x16x2xf32, #tpu.memory_space<vmem>>, vector<1x16x1xf32>,
    return
  }
  func.func @transform_0(%arg0: i32) -> (i32, i32, i32) {
    %c0_i32 = arith.constant 0 : i32
    %c0_i32_0 = arith.constant 0 : i32
    %c0_i32_1 = arith.constant 0 : i32
    return %arg0, %c0_i32, %c0_i32_0 : i32, i32, i32
  }
  func.func @transform_1(%arg0: i32) -> (i32, i32, i32) {
    %c0_i32 = arith.constant 0 : i32
    %c0_i32_0 = arith.constant 0 : i32
    %c0_i32_1 = arith.constant 0 : i32
    return %arg0, %c0_i32, %c0_i32_0 : i32, i32, i32
  }
}

module attributes {stable_mosaic.version = 11 : i64} {
  func.func @_bn2_stats_kernel(%arg0: i32, %arg1: memref<1x16x256xf32, #tpu.memory_space<vmem>>, %arg2: memref<16x1xf32, #tpu.memory_space<vmem>>, %arg3: memref<16x1xf32, #tpu.memory_space<vmem>>, %arg4: memref<32x16xf32, #tpu.memory_space<vmem>>, %arg5: memref<1x32x2xf32, #tpu.memory_space<vmem>>) attributes {dimension_semantics = [#tpu.dimension_semantics<parallel>], iteration_bounds = array<i64: 2>, scalar_prefetch = 0 : i64, scratch_operands = 0 : i64, tpu.core_type = #tpu.core_type<tc>, window_params = [{transform_indices = @transform_0, window_bounds = array<i64: 1, 16, 256>}, {pipeline_mode = #tpu.pipeline_mode<synchronous>, transform_indices = @transform_1, window_bounds = array<i64: 16, 1>}, {pipeline_mode = #tpu.pipeline_mode<synchronous>, transform_indices = @transform_2, window_bounds = array<i64: 16, 1>}, {pipeline_mode = #tpu.pipeline_mode<synchronous>, transform_indices = @transform_3, window_bounds = array<i64: 32, 16>}, {transform_indices = @transform_4, window_bounds = array<i64: 1, 32, 2>}]} {
    %c0 = arith.constant 0 : index
    %c0_0 = arith.constant 0 : index
    %c0_1 = arith.constant 0 : index
    %0 = vector.load %arg1[%c0, %c0_0, %c0_1] : memref<1x16x256xf32, #tpu.memory_space<vmem>>, vector<1x16x256xf32>
    %1 = vector.shape_cast %0 : vector<1x16x256xf32> to vector<16x256xf32>
    %c0_2 = arith.constant 0 : index
    %c0_3 = arith.constant 0 : index
    %2 = vector.load %arg2[%c0_2, %c0_3] : memref<16x1xf32, #tpu.memory_space<vmem>>, vector<16x1xf32>
    %3 = vector.broadcast %2 : vector<16x1xf32> to vector<16x256xf32>
    %4 = arith.mulf %1, %3 : vector<16x256xf32>
    %c0_4 = arith.constant 0 : index
    %c0_5 = arith.constant 0 : index
    %5 = vector.load %arg3[%c0_4, %c0_5] : memref<16x1xf32, #tpu.memory_space<vmem>>, vector<16x1xf32>
    %6 = vector.broadcast %5 : vector<16x1xf32> to vector<16x256xf32>
    %7 = arith.addf %4, %6 : vector<16x256xf32>
    %cst = arith.constant 0.000000e+00 : f32
    %8 = vector.broadcast %cst : f32 to vector<16x256xf32>
    %9 = arith.maximumf %7, %8 : vector<16x256xf32>
    %c0_6 = arith.constant 0 : index
    %c0_7 = arith.constant 0 : index
    %10 = vector.load %arg4[%c0_6, %c0_7] : memref<32x16xf32, #tpu.memory_space<vmem>>, vector<32x16xf32>
    %cst_8 = arith.constant dense<0.000000e+00> : vector<32x256xf32>
    %11 = tpu.matmul %10, %9, %cst_8 {dimension_numbers = #tpu.dot_dimension_numbers<[1], [0], [0], [1], [0, 0, 1, 1], [], []>} : vector<32x16xf32>, vector<16x256xf32>, vector<32x256xf32> -> vector<32x256xf32>
    %cst_9 = arith.constant dense<0.000000e+00> : vector<32xf32>
    %12 = vector.multi_reduction <add>, %11, %cst_9 [1] : vector<32x256xf32> to vector<32xf32>
    %13 = vector.shape_cast %12 : vector<32xf32> to vector<32x1xf32>
    %c0_10 = arith.constant 0 : index
    %c0_11 = arith.constant 0 : index
    %c0_12 = arith.constant 0 : index
    %14 = vector.load %arg5[%c0_10, %c0_11, %c0_12] : memref<1x32x2xf32, #tpu.memory_space<vmem>>, vector<1x32x1xf32>
    %15 = vector.shape_cast %14 : vector<1x32x1xf32> to vector<32x1xf32>
    %16 = vector.shape_cast %13 : vector<32x1xf32> to vector<1x32x1xf32>
    tpu.vector_store %arg5[%c0_10, %c0_11, %c0_12], %16 {strides = array<i32>} : memref<1x32x2xf32, #tpu.memory_space<vmem>>, vector<1x32x1xf32>,
    %17 = arith.mulf %11, %11 : vector<32x256xf32>
    %cst_13 = arith.constant dense<0.000000e+00> : vector<32xf32>
    %18 = vector.multi_reduction <add>, %17, %cst_13 [1] : vector<32x256xf32> to vector<32xf32>
    %19 = vector.shape_cast %18 : vector<32xf32> to vector<32x1xf32>
    %c0_14 = arith.constant 0 : index
    %c0_15 = arith.constant 0 : index
    %c1 = arith.constant 1 : index
    %20 = vector.load %arg5[%c0_14, %c0_15, %c1] : memref<1x32x2xf32, #tpu.memory_space<vmem>>, vector<1x32x1xf32>
    %21 = vector.shape_cast %20 : vector<1x32x1xf32> to vector<32x1xf32>
    %22 = vector.shape_cast %19 : vector<32x1xf32> to vector<1x32x1xf32>
    tpu.vector_store %arg5[%c0_14, %c0_15, %c1], %22 {strides = array<i32>} : memref<1x32x2xf32, #tpu.memory_space<vmem>>, vector<1x32x1xf32>,
    return
  }
  func.func @transform_0(%arg0: i32) -> (i32, i32, i32) {
    %c0_i32 = arith.constant 0 : i32
    %c0_i32_0 = arith.constant 0 : i32
    %c0_i32_1 = arith.constant 0 : i32
    return %arg0, %c0_i32, %c0_i32_0 : i32, i32, i32
  }
  func.func @transform_1(%arg0: i32) -> (i32, i32) {
    %c0_i32 = arith.constant 0 : i32
    %c0_i32_0 = arith.constant 0 : i32
    %c0_i32_1 = arith.constant 0 : i32
    return %c0_i32, %c0_i32_0 : i32, i32
  }
  func.func @transform_2(%arg0: i32) -> (i32, i32) {
    %c0_i32 = arith.constant 0 : i32
    %c0_i32_0 = arith.constant 0 : i32
    %c0_i32_1 = arith.constant 0 : i32
    return %c0_i32, %c0_i32_0 : i32, i32
  }
  func.func @transform_3(%arg0: i32) -> (i32, i32) {
    %c0_i32 = arith.constant 0 : i32
    %c0_i32_0 = arith.constant 0 : i32
    %c0_i32_1 = arith.constant 0 : i32
    return %c0_i32, %c0_i32_0 : i32, i32
  }
  func.func @transform_4(%arg0: i32) -> (i32, i32, i32) {
    %c0_i32 = arith.constant 0 : i32
    %c0_i32_0 = arith.constant 0 : i32
    %c0_i32_1 = arith.constant 0 : i32
    return %arg0, %c0_i32, %c0_i32_0 : i32, i32, i32
  }
}

module attributes {stable_mosaic.version = 11 : i64} {
  func.func @_bottleneck_out_kernel(%arg0: i32, %arg1: memref<1x16x256xf32, #tpu.memory_space<vmem>>, %arg2: memref<16x1xf32, #tpu.memory_space<vmem>>, %arg3: memref<16x1xf32, #tpu.memory_space<vmem>>, %arg4: memref<32x16xf32, #tpu.memory_space<vmem>>, %arg5: memref<32x1xf32, #tpu.memory_space<vmem>>, %arg6: memref<32x1xf32, #tpu.memory_space<vmem>>, %arg7: memref<8x288xf32, #tpu.memory_space<vmem>>, %arg8: memref<9x256xf32, #tpu.memory_space<vmem>>, %arg9: memref<1x24x256xf32, #tpu.memory_space<vmem>>, %arg10: memref<288x256xf32, #tpu.memory_space<vmem>>) attributes {dimension_semantics = [#tpu.dimension_semantics<parallel>], iteration_bounds = array<i64: 2>, scalar_prefetch = 0 : i64, scratch_operands = 1 : i64, tpu.core_type = #tpu.core_type<tc>, window_params = [{transform_indices = @transform_0, window_bounds = array<i64: 1, 16, 256>}, {pipeline_mode = #tpu.pipeline_mode<synchronous>, transform_indices = @transform_1, window_bounds = array<i64: 16, 1>}, {pipeline_mode = #tpu.pipeline_mode<synchronous>, transform_indices = @transform_2, window_bounds = array<i64: 16, 1>}, {pipeline_mode = #tpu.pipeline_mode<synchronous>, transform_indices = @transform_3, window_bounds = array<i64: 32, 16>}, {pipeline_mode = #tpu.pipeline_mode<synchronous>, transform_indices = @transform_4, window_bounds = array<i64: 32, 1>}, {pipeline_mode = #tpu.pipeline_mode<synchronous>, transform_indices = @transform_5, window_bounds = array<i64: 32, 1>}, {pipeline_mode = #tpu.pipeline_mode<synchronous>, transform_indices = @transform_6, window_bounds = array<i64: 8, 288>}, {pipeline_mode = #tpu.pipeline_mode<synchronous>, transform_indices = @transform_7, window_bounds = array<i64: 9, 256>}, {transform_indices = @transform_8, window_bounds = array<i64: 1, 24, 256>}]} {
    %c0 = arith.constant 0 : index
    %c0_0 = arith.constant 0 : index
    %c0_1 = arith.constant 0 : index
    %0 = vector.load %arg1[%c0, %c0_0, %c0_1] : memref<1x16x256xf32, #tpu.memory_space<vmem>>, vector<1x16x256xf32>
    %1 = vector.shape_cast %0 : vector<1x16x256xf32> to vector<16x256xf32>
    %c0_2 = arith.constant 0 : index
    %c0_3 = arith.constant 0 : index
    %2 = vector.load %arg2[%c0_2, %c0_3] : memref<16x1xf32, #tpu.memory_space<vmem>>, vector<16x1xf32>
    %3 = vector.broadcast %2 : vector<16x1xf32> to vector<16x256xf32>
    %4 = arith.mulf %1, %3 : vector<16x256xf32>
    %c0_4 = arith.constant 0 : index
    %c0_5 = arith.constant 0 : index
    %5 = vector.load %arg3[%c0_4, %c0_5] : memref<16x1xf32, #tpu.memory_space<vmem>>, vector<16x1xf32>
    %6 = vector.broadcast %5 : vector<16x1xf32> to vector<16x256xf32>
    %7 = arith.addf %4, %6 : vector<16x256xf32>
    %cst = arith.constant 0.000000e+00 : f32
    %8 = vector.broadcast %cst : f32 to vector<16x256xf32>
    %9 = arith.maximumf %7, %8 : vector<16x256xf32>
    %c0_6 = arith.constant 0 : index
    %c0_7 = arith.constant 0 : index
    %10 = vector.load %arg4[%c0_6, %c0_7] : memref<32x16xf32, #tpu.memory_space<vmem>>, vector<32x16xf32>
    %cst_8 = arith.constant dense<0.000000e+00> : vector<32x256xf32>
    %11 = tpu.matmul %10, %9, %cst_8 {dimension_numbers = #tpu.dot_dimension_numbers<[1], [0], [0], [1], [0, 0, 1, 1], [], []>} : vector<32x16xf32>, vector<16x256xf32>, vector<32x256xf32> -> vector<32x256xf32>
    %c0_9 = arith.constant 0 : index
    %c0_10 = arith.constant 0 : index
    %12 = vector.load %arg5[%c0_9, %c0_10] : memref<32x1xf32, #tpu.memory_space<vmem>>, vector<32x1xf32>
    %13 = vector.broadcast %12 : vector<32x1xf32> to vector<32x256xf32>
    %14 = arith.mulf %11, %13 : vector<32x256xf32>
    %c0_11 = arith.constant 0 : index
    %c0_12 = arith.constant 0 : index
    %15 = vector.load %arg6[%c0_11, %c0_12] : memref<32x1xf32, #tpu.memory_space<vmem>>, vector<32x1xf32>
    %16 = vector.broadcast %15 : vector<32x1xf32> to vector<32x256xf32>
    %17 = arith.addf %14, %16 : vector<32x256xf32>
    %cst_13 = arith.constant 0.000000e+00 : f32
    %18 = vector.broadcast %cst_13 : f32 to vector<32x256xf32>
    %19 = arith.maximumf %17, %18 : vector<32x256xf32>
    %c17_i32 = arith.constant 17 : i32
    %20 = tpu.dynamic_rotate %19 by %c17_i32 dim 1 : vector<32x256xf32>, i32 -> vector<32x256xf32>
    %c0_14 = arith.constant 0 : index
    %c0_15 = arith.constant 0 : index
    %21 = vector.load %arg8[%c0_14, %c0_15] : memref<9x256xf32, #tpu.memory_space<vmem>>, vector<1x256xf32>
    %22 = vector.broadcast %21 : vector<1x256xf32> to vector<32x256xf32>
    %23 = arith.mulf %20, %22 : vector<32x256xf32>
    %c0_16 = arith.constant 0 : index
    %c0_17 = arith.constant 0 : index
    %24 = vector.load %arg10[%c0_16, %c0_17] : memref<288x256xf32, #tpu.memory_space<vmem>>, vector<32x256xf32>
    tpu.vector_store %arg10[%c0_16, %c0_17], %23 {strides = array<i32>} : memref<288x256xf32, #tpu.memory_space<vmem>>, vector<32x256xf32>,
    %c16_i32 = arith.constant 16 : i32
    %25 = tpu.dynamic_rotate %19 by %c16_i32 dim 1 : vector<32x256xf32>, i32 -> vector<32x256xf32>
    %c1 = arith.constant 1 : index
    %c0_18 = arith.constant 0 : index
    %26 = vector.load %arg8[%c1, %c0_18] : memref<9x256xf32, #tpu.memory_space<vmem>>, vector<1x256xf32>
    %27 = vector.broadcast %26 : vector<1x256xf32> to vector<32x256xf32>
    %28 = arith.mulf %25, %27 : vector<32x256xf32>
    %c32 = arith.constant 32 : index
    %c0_19 = arith.constant 0 : index
    %29 = vector.load %arg10[%c32, %c0_19] : memref<288x256xf32, #tpu.memory_space<vmem>>, vector<32x256xf32>
    tpu.vector_store %arg10[%c32, %c0_19], %28 {strides = array<i32>} : memref<288x256xf32, #tpu.memory_space<vmem>>, vector<32x256xf32>,
    %c15_i32 = arith.constant 15 : i32
    %30 = tpu.dynamic_rotate %19 by %c15_i32 dim 1 : vector<32x256xf32>, i32 -> vector<32x256xf32>
    %c2 = arith.constant 2 : index
    %c0_20 = arith.constant 0 : index
    %31 = vector.load %arg8[%c2, %c0_20] : memref<9x256xf32, #tpu.memory_space<vmem>>, vector<1x256xf32>
    %32 = vector.broadcast %31 : vector<1x256xf32> to vector<32x256xf32>
    %33 = arith.mulf %30, %32 : vector<32x256xf32>
    %c64 = arith.constant 64 : index
    %c0_21 = arith.constant 0 : index
    %34 = vector.load %arg10[%c64, %c0_21] : memref<288x256xf32, #tpu.memory_space<vmem>>, vector<32x256xf32>
    tpu.vector_store %arg10[%c64, %c0_21], %33 {strides = array<i32>} : memref<288x256xf32, #tpu.memory_space<vmem>>, vector<32x256xf32>,
    %c1_i32 = arith.constant 1 : i32
    %35 = tpu.dynamic_rotate %19 by %c1_i32 dim 1 : vector<32x256xf32>, i32 -> vector<32x256xf32>
    %c3 = arith.constant 3 : index
    %c0_22 = arith.constant 0 : index
    %36 = vector.load %arg8[%c3, %c0_22] : memref<9x256xf32, #tpu.memory_space<vmem>>, vector<1x256xf32>
    %37 = vector.broadcast %36 : vector<1x256xf32> to vector<32x256xf32>
    %38 = arith.mulf %35, %37 : vector<32x256xf32>
    %c96 = arith.constant 96 : index
    %c0_23 = arith.constant 0 : index
    %39 = vector.load %arg10[%c96, %c0_23] : memref<288x256xf32, #tpu.memory_space<vmem>>, vector<32x256xf32>
    tpu.vector_store %arg10[%c96, %c0_23], %38 {strides = array<i32>} : memref<288x256xf32, #tpu.memory_space<vmem>>, vector<32x256xf32>,
    %c128 = arith.constant 128 : index
    %c0_24 = arith.constant 0 : index
    %40 = vector.load %arg10[%c128, %c0_24] : memref<288x256xf32, #tpu.memory_space<vmem>>, vector<32x256xf32>
    tpu.vector_store %arg10[%c128, %c0_24], %19 {strides = array<i32>} : memref<288x256xf32, #tpu.memory_space<vmem>>, vector<32x256xf32>,
    %c255_i32 = arith.constant 255 : i32
    %41 = tpu.dynamic_rotate %19 by %c255_i32 dim 1 : vector<32x256xf32>, i32 -> vector<32x256xf32>
    %c5 = arith.constant 5 : index
    %c0_25 = arith.constant 0 : index
    %42 = vector.load %arg8[%c5, %c0_25] : memref<9x256xf32, #tpu.memory_space<vmem>>, vector<1x256xf32>
    %43 = vector.broadcast %42 : vector<1x256xf32> to vector<32x256xf32>
    %44 = arith.mulf %41, %43 : vector<32x256xf32>
    %c160 = arith.constant 160 : index
    %c0_26 = arith.constant 0 : index
    %45 = vector.load %arg10[%c160, %c0_26] : memref<288x256xf32, #tpu.memory_space<vmem>>, vector<32x256xf32>
    tpu.vector_store %arg10[%c160, %c0_26], %44 {strides = array<i32>} : memref<288x256xf32, #tpu.memory_space<vmem>>, vector<32x256xf32>,
    %c241_i32 = arith.constant 241 : i32
    %46 = tpu.dynamic_rotate %19 by %c241_i32 dim 1 : vector<32x256xf32>, i32 -> vector<32x256xf32>
    %c6 = arith.constant 6 : index
    %c0_27 = arith.constant 0 : index
    %47 = vector.load %arg8[%c6, %c0_27] : memref<9x256xf32, #tpu.memory_space<vmem>>, vector<1x256xf32>
    %48 = vector.broadcast %47 : vector<1x256xf32> to vector<32x256xf32>
    %49 = arith.mulf %46, %48 : vector<32x256xf32>
    %c192 = arith.constant 192 : index
    %c0_28 = arith.constant 0 : index
    %50 = vector.load %arg10[%c192, %c0_28] : memref<288x256xf32, #tpu.memory_space<vmem>>, vector<32x256xf32>
    tpu.vector_store %arg10[%c192, %c0_28], %49 {strides = array<i32>} : memref<288x256xf32, #tpu.memory_space<vmem>>, vector<32x256xf32>,
    %c240_i32 = arith.constant 240 : i32
    %51 = tpu.dynamic_rotate %19 by %c240_i32 dim 1 : vector<32x256xf32>, i32 -> vector<32x256xf32>
    %c7 = arith.constant 7 : index
    %c0_29 = arith.constant 0 : index
    %52 = vector.load %arg8[%c7, %c0_29] : memref<9x256xf32, #tpu.memory_space<vmem>>, vector<1x256xf32>
    %53 = vector.broadcast %52 : vector<1x256xf32> to vector<32x256xf32>
    %54 = arith.mulf %51, %53 : vector<32x256xf32>
    %c224 = arith.constant 224 : index
    %c0_30 = arith.constant 0 : index
    %55 = vector.load %arg10[%c224, %c0_30] : memref<288x256xf32, #tpu.memory_space<vmem>>, vector<32x256xf32>
    tpu.vector_store %arg10[%c224, %c0_30], %54 {strides = array<i32>} : memref<288x256xf32, #tpu.memory_space<vmem>>, vector<32x256xf32>,
    %c239_i32 = arith.constant 239 : i32
    %56 = tpu.dynamic_rotate %19 by %c239_i32 dim 1 : vector<32x256xf32>, i32 -> vector<32x256xf32>
    %c8 = arith.constant 8 : index
    %c0_31 = arith.constant 0 : index
    %57 = vector.load %arg8[%c8, %c0_31] : memref<9x256xf32, #tpu.memory_space<vmem>>, vector<1x256xf32>
    %58 = vector.broadcast %57 : vector<1x256xf32> to vector<32x256xf32>
    %59 = arith.mulf %56, %58 : vector<32x256xf32>
    %c256 = arith.constant 256 : index
    %c0_32 = arith.constant 0 : index
    %60 = vector.load %arg10[%c256, %c0_32] : memref<288x256xf32, #tpu.memory_space<vmem>>, vector<32x256xf32>
    tpu.vector_store %arg10[%c256, %c0_32], %59 {strides = array<i32>} : memref<288x256xf32, #tpu.memory_space<vmem>>, vector<32x256xf32>,
    %c0_33 = arith.constant 0 : index
    %c0_34 = arith.constant 0 : index
    %61 = vector.load %arg7[%c0_33, %c0_34] : memref<8x288xf32, #tpu.memory_space<vmem>>, vector<8x288xf32>
    %c0_35 = arith.constant 0 : index
    %c0_36 = arith.constant 0 : index
    %62 = vector.load %arg10[%c0_35, %c0_36] : memref<288x256xf32, #tpu.memory_space<vmem>>, vector<288x256xf32>
    %cst_37 = arith.constant dense<0.000000e+00> : vector<8x256xf32>
    %63 = tpu.matmul %61, %62, %cst_37 {dimension_numbers = #tpu.dot_dimension_numbers<[1], [0], [0], [1], [0, 0, 1, 1], [], []>} : vector<8x288xf32>, vector<288x256xf32>, vector<8x256xf32> -> vector<8x256xf32>
    %c0_38 = arith.constant 0 : index
    %c0_39 = arith.constant 0 : index
    %c0_40 = arith.constant 0 : index
    %64 = vector.load %arg9[%c0_38, %c0_39, %c0_40] : memref<1x24x256xf32, #tpu.memory_space<vmem>>, vector<1x16x256xf32>
    %65 = vector.shape_cast %64 : vector<1x16x256xf32> to vector<16x256xf32>
    %66 = vector.shape_cast %1 : vector<16x256xf32> to vector<1x16x256xf32>
    tpu.vector_store %arg9[%c0_38, %c0_39, %c0_40], %66 {strides = array<i32>} : memref<1x24x256xf32, #tpu.memory_space<vmem>>, vector<1x16x256xf32>,
    %c0_41 = arith.constant 0 : index
    %c16 = arith.constant 16 : index
    %c0_42 = arith.constant 0 : index
    %67 = vector.load %arg9[%c0_41, %c16, %c0_42] : memref<1x24x256xf32, #tpu.memory_space<vmem>>, vector<1x8x256xf32>
    %68 = vector.shape_cast %67 : vector<1x8x256xf32> to vector<8x256xf32>
    %69 = vector.shape_cast %63 : vector<8x256xf32> to vector<1x8x256xf32>
    tpu.vector_store %arg9[%c0_41, %c16, %c0_42], %69 {strides = array<i32>} : memref<1x24x256xf32, #tpu.memory_space<vmem>>, vector<1x8x256xf32>,
    return
  }
  func.func @transform_0(%arg0: i32) -> (i32, i32, i32) {
    %c0_i32 = arith.constant 0 : i32
    %c0_i32_0 = arith.constant 0 : i32
    %c0_i32_1 = arith.constant 0 : i32
    return %arg0, %c0_i32, %c0_i32_0 : i32, i32, i32
  }
  func.func @transform_1(%arg0: i32) -> (i32, i32) {
    %c0_i32 = arith.constant 0 : i32
    %c0_i32_0 = arith.constant 0 : i32
    %c0_i32_1 = arith.constant 0 : i32
    return %c0_i32, %c0_i32_0 : i32, i32
  }
  func.func @transform_2(%arg0: i32) -> (i32, i32) {
    %c0_i32 = arith.constant 0 : i32
    %c0_i32_0 = arith.constant 0 : i32
    %c0_i32_1 = arith.constant 0 : i32
    return %c0_i32, %c0_i32_0 : i32, i32
  }
  func.func @transform_3(%arg0: i32) -> (i32, i32) {
    %c0_i32 = arith.constant 0 : i32
    %c0_i32_0 = arith.constant 0 : i32
    %c0_i32_1 = arith.constant 0 : i32
    return %c0_i32, %c0_i32_0 : i32, i32
  }
  func.func @transform_4(%arg0: i32) -> (i32, i32) {
    %c0_i32 = arith.constant 0 : i32
    %c0_i32_0 = arith.constant 0 : i32
    %c0_i32_1 = arith.constant 0 : i32
    return %c0_i32, %c0_i32_0 : i32, i32
  }
  func.func @transform_5(%arg0: i32) -> (i32, i32) {
    %c0_i32 = arith.constant 0 : i32
    %c0_i32_0 = arith.constant 0 : i32
    %c0_i32_1 = arith.constant 0 : i32
    return %c0_i32, %c0_i32_0 : i32, i32
  }
  func.func @transform_6(%arg0: i32) -> (i32, i32) {
    %c0_i32 = arith.constant 0 : i32
    %c0_i32_0 = arith.constant 0 : i32
    %c0_i32_1 = arith.constant 0 : i32
    return %c0_i32, %c0_i32_0 : i32, i32
  }
  func.func @transform_7(%arg0: i32) -> (i32, i32) {
    %c0_i32 = arith.constant 0 : i32
    %c0_i32_0 = arith.constant 0 : i32
    %c0_i32_1 = arith.constant 0 : i32
    return %c0_i32, %c0_i32_0 : i32, i32
  }
  func.func @transform_8(%arg0: i32) -> (i32, i32, i32) {
    %c0_i32 = arith.constant 0 : i32
    %c0_i32_0 = arith.constant 0 : i32
    %c0_i32_1 = arith.constant 0 : i32
    return %arg0, %c0_i32, %c0_i32_0 : i32, i32, i32
  }
}

</mosaic_0001>

<bundles_post_ra>
// kernel: bottleneck_forward.3
= control target key start
LH: loop header
LB: loop body
LE: loop exit
PB: predicated region body
PF: predicated region fallthrough
CT: control target
= control target key end

     0   :  { %s237_s6 = smov 0   ;;  %s254_s0 = inlined_call_operand.vmem [shape: f32[2,16,256], index: 0, kind: input, shape index: {}]   ;;  %s255_s1 = inlined_call_operand.vmem [shape: f32[2,16,2], index: 1, kind: output, shape index: {}]  }
   0x1 LB: > { %s198_s7 = sadd.s32 4294967295, %s225_s6   ;;  %p202_p0 = scmp.ge.s32.totalorder %s225_s6, 1  ;;  %s225_s6 = sphi %s237_s6, %s11_s6  }
   0x2   : > { %p87_p1 = scmp.lt.s32.totalorder %s225_s6, 3 }
   0x4   : > { %p88_p2 = pnand %p202_p0, %p87_p1 }
   0x5   : > { %p107_p3 = scmp.lt.s32.totalorder (!%p88_p2), %s198_s7, 1  ;;  %vm127_vm0 = vcmask (!%p88_p2), 7168   ;;  %vm140_vm1 = vcmask (!%p88_p2), 15368  }
   0x6   : > { %91 = sbr.rel (%p88_p2) target bundleno = 168 (0xa8), region = 24 }
   0xd   : > { %s257_s7 = smov (!%p107_p3, %s198_s7), 1 }
   0xe   : > { %s209_s8 = sshll.u32 %s257_s7, 5  ;;  %s210_s12 = sshll.u32 %s257_s7, 4 }
   0xf   : > { %s111_s11 = scalar_lea.vmem %s254_s0, %s209_s8  ;;  %s116_s15 = scalar_lea.vmem %s255_s1, %s210_s12 }
  0x10   : > { %v117_v0 = vld [vmem:[%s111_s11] sm:$0xff]  ;;  %v118_v1 = vld [vmem:[%s111_s11 + $0x8] sm:$0xff]  ;;  %v119_v2 = vld [vmem:[%s111_s11 + $0x10] sm:$0xff] }
  0x11   : > { %v121_v3 = vadd.f32 %v118_v1, %v117_v0  ;;  %v130_v4 = vmul.f32 %v117_v0, %v117_v0  ;;  %v131_v5 = vmul.f32 %v118_v1, %v118_v1  ;;  %v120_v6 = vld [vmem:[%s111_s11 + $0x18] sm:$0xff]  ;;  %v132_v7 = vmul.f32 %v119_v2, %v119_v2 }
  0x12   : > { %v133_v8 = vmul.f32 %v120_v6, %v120_v6  ;;  %v124_v10 = vadd.f32 %v120_v6, %v119_v2 }
  0x13   : > { %122 = vadd.xlane.f32.xlu0 %v121_v3  ;;  %v134_v9 = vadd.f32 %v131_v5, %v130_v4 }
  0x14   : > { %v137_v11 = vadd.f32 %v133_v8, %v132_v7 }
  0x15   : > { %135 = vadd.xlane.f32.xlu1 %v134_v9 }
  0x17   : > { %125 = vadd.xlane.f32.xlu0 %v124_v10 }
  0x19   : > { %138 = vadd.xlane.f32.xlu1 %v137_v11 }
  0xa0   : > { %v123_v12 = vpop.xlane.xlu0 %122 }
  0xa1   : > { %128 = vst.msk [vmem:[%s116_s15] sm:$0xff] %vm127_vm0, %v123_v12 }
  0xa2   : > { %v136_v13 = vpop.xlane.xlu1 %135 }
  0xa3   : > { %141 = vst.msk [vmem:[%s116_s15] sm:$0xff] %vm140_vm1, %v136_v13 }
  0xa4   : > { %v126_v14 = vpop.xlane.xlu0 %125 }
  0xa5   : > { %129 = vst.msk [vmem:[%s116_s15 + $0x8] sm:$0xff] %vm127_vm0, %v126_v14 }
  0xa6   : > { %v139_v15 = vpop.xlane.xlu1 %138 }
  0xa7   : > { %142 = vst.msk [vmem:[%s116_s15 + $0x8] sm:$0xff] %vm140_vm1, %v139_v15 }
  0xa8 PF: > { %s11_s6 = sadd.s32 1, %s225_s6  }
  0xa9   : > { %p8_p4 = scmp.ge.s32.totalorder %s11_s6, 4  }
  0xab   :  { %10 = sbr.rel (!%p8_p4) target bundleno = 1 (0x1), region = 54 }

// kernel: bottleneck_forward.4
= control target key start
LH: loop header
LB: loop body
LE: loop exit
PB: predicated region body
PF: predicated region fallthrough
CT: control target
= control target key end

     0   :  { %s511_s15 = smov 0   ;;  %s559_s0 = inlined_call_operand.vmem [shape: f32[2,16,256], index: 0, kind: input, shape index: {}]   ;;  %s560_s1 = inlined_call_operand.vmem [shape: f32[16,1], index: 1, kind: input, shape index: {}]   ;;  %s561_s2 = inlined_call_operand.vmem [shape: f32[16,1], index: 2, kind: input, shape index: {}]   ;;  %s562_s3 = inlined_call_operand.vmem [shape: f32[32,16], index: 3, kind: input, shape index: {}]   ;;  %s563_s4 = inlined_call_operand.vmem [shape: f32[2,32,2], index: 4, kind: output, shape index: {}]  }
   0x1 LB: > { %s441_s16 = sadd.s32 4294967295, %s482_s15   ;;  %p445_p0 = scmp.ge.s32.totalorder %s482_s15, 1  ;;  %s482_s15 = sphi %s511_s15, %s14_s15  }
   0x2   : > { %p162_p1 = scmp.lt.s32.totalorder %s482_s15, 3 }
   0x4   : > { %p163_p2 = pnand %p445_p0, %p162_p1 }
   0x5   : > { %v218_v0 = vld [vmem:[%s561_s2] sm:$0xff] (!%p163_p2)  ;;  %v484_v2 = vmov (!%p163_p2), 0   ;;  %v219_v3 = vld [vmem:[%s561_s2 + $0x8] sm:$0xff] (!%p163_p2)  ;;  %v485_v5 = vmov (!%p163_p2), 0.0   ;;  %p188_p3 = scmp.lt.s32.totalorder (!%p163_p2), %s441_s16, 1  ;;  %vm242_vm0 = vcmask (!%p163_p2), 130048  }
   0x6   : > { %166 = sbr.rel (%p163_p2) target bundleno = 525 (0x20d), region = 36  ;;  %v202_v1 = vld [vmem:[%s560_s1] sm:$0xff] (!%p163_p2)  ;;  %475 = vset.pattern.permute.xlu1 (!%p163_p2), %v484_v2  ;;  %474 = vset.pattern.permute.xlu0 (!%p163_p2), %v484_v2  ;;  %v203_v4 = vld [vmem:[%s560_s1 + $0x8] sm:$0xff] (!%p163_p2)  ;;  %v240_v29 = vld [vmem:[%s562_s3 + $0x10] sm:$0xff] (!%p163_p2)  ;;  %vm356_vm1 = vcmask (!%p163_p2), 7168   ;;  %vm381_vm2 = vcmask (!%p163_p2), 15368  }
   0x7   : > { %222 = vperm.xlu1 (!%p163_p2), %475, %v218_v0   ;;  %206 = vperm.xlu0 (!%p163_p2), %474, %v202_v1   ;;  %v238_v28 = vld [vmem:[%s562_s3] sm:$0xff] (!%p163_p2)  ;;  %v239_v30 = vld [vmem:[%s562_s3 + $0x8] sm:$0xff] (!%p163_p2)  ;;  %v241_v31 = vld [vmem:[%s562_s3 + $0x18] sm:$0xff] (!%p163_p2) }
   0x8   : > { %319 = vmatprep.mubr.f32.mxu0 (!%p163_p2), %v485_v5  ;;  %331 = vmatprep.mubr.f32.mxu1 (!%p163_p2), %v485_v5 }
   0xb   : > { %227 = vperm.xlu1 (!%p163_p2), %475, %v219_v3   ;;  %211 = vperm.xlu0 (!%p163_p2), %474, %v203_v4  }
   0xd   : > { %s565_s16 = smov (!%p188_p3, %s441_s16), 1 }
   0xe   : > { %s456_s25 = sshll.u32 %s565_s16, 5 }
   0xf   : > { %s192_s28 = scalar_lea.vmem %s559_s0, %s456_s25  ;;  %s197_s13 = scalar_lea.vmem %s563_s4, %s456_s25 }
  0x10   : > { %v198_v6 = vld [vmem:[%s192_s28] sm:$0xff]  ;;  %v199_v7 = vld [vmem:[%s192_s28 + $0x8] sm:$0xff]  ;;  %v200_v12 = vld [vmem:[%s192_s28 + $0x10] sm:$0xff] }
  0x11   : > { %v201_v13 = vld [vmem:[%s192_s28 + $0x18] sm:$0xff] }
  0x86   : > { %v223_v8 = vpop.permute.xlu1 %222  ;;  %v207_v9 = vpop.permute.xlu0 %206 }
  0x87   : > { %v214_v10 = vmul.f32 %v207_v9, %v198_v6  ;;  %v215_v11 = vmul.f32 %v207_v9, %v199_v7 }
  0x89   : > { %v230_v15 = vadd.f32 %v223_v8, %v214_v10  ;;  %v231_v16 = vadd.f32 %v223_v8, %v215_v11 }
  0x8a   : > { %v212_v14 = vpop.permute.xlu0 %211  ;;  %v228_v19 = vpop.permute.xlu1 %227 }
  0x8b   : > { %v216_v17 = vmul.f32 %v212_v14, %v200_v12  ;;  %v217_v18 = vmul.f32 %v212_v14, %v201_v13  ;;  %v235_v22 = vmax.f32 %v231_v16, 0.0  ;;  %v234_v24 = vmax.f32 %v230_v15, 0.0 }
  0x8d   : > { %v232_v20 = vadd.f32 %v228_v19, %v216_v17  ;;  %v233_v21 = vadd.f32 %v228_v19, %v217_v18 }
  0x8f   : > { %v237_v23 = vmax.f32 %v233_v21, 0.0  ;;  %v236_v25 = vmax.f32 %v232_v20, 0.0 }
  0x91   : > { %v458_v26 = vpack.c.bf16 %v237_v23, %v235_v22  ;;  %v460_v27 = vpack.c.bf16 %v236_v25, %v234_v24 }
  0x93   : > { %459 = vmatprep.subr.bf16.mxu0 %v458_v26  ;;  %462 = vmatprep.subr.bf16.mxu1 %v458_v26 }
  0x94   : > { %461 = vmatpush1.bf16.msra.mxu0 %v460_v27  ;;  %463 = vmatpush1.bf16.msra.mxu1 %v460_v27 }
  0x97   : > { %450 = vmatmul.mubr.msk.f32.vlgmr.msra.gmra.mrb[0].mxu0 %vm242_vm0, %v238_v28  ;;  %452 = vmatmul.mubr.msk.f32.vlgmr.msra.gmra.mrb[0].mxu1 %vm242_vm0, %v240_v29 }
  0x98   : > { %325 = vmatprep.mubr.f32.mxu0 %v485_v5  ;;  %337 = vmatprep.mubr.f32.mxu1 %v485_v5 }
  0x9b   : > { %451 = vmatmul.mubr.msk.f32.gmra.mrb[2].mxu0 %vm242_vm0, %v239_v30  ;;  %453 = vmatmul.mubr.msk.f32.gmra.mrb[2].mxu1 %vm242_vm0, %v241_v31 }
 0x16a   : > { %v321_v32 = vpop.f32.mrb[0].mxu0  ;;  %v333_v33 = vpop.f32.mrb[0].mxu1 }
 0x16b   : > { %v361_v34 = vmul.f32 %v321_v32, %v321_v32  ;;  %v323_v35 = vpop.f32.mrb[1].mxu0  ;;  %v365_v36 = vmul.f32 %v333_v33, %v333_v33  ;;  %v335_v37 = vpop.f32.mrb[1].mxu1 }
 0x16c   : > { %v362_v38 = vmul.f32 %v323_v35, %v323_v35  ;;  %v366_v39 = vmul.f32 %v335_v37, %v335_v37  ;;  %v344_v40 = vadd.f32 %v323_v35, %v321_v32  ;;  %v350_v41 = vadd.f32 %v335_v37, %v333_v33 }
 0x16e   : > { %345 = vadd.xlane.f32.xlu0 %v344_v40  ;;  %v369_v42 = vadd.f32 %v362_v38, %v361_v34  ;;  %v327_v43 = vpop.f32.mrb[2].mxu0  ;;  %v339_v44 = vpop.f32.mrb[2].mxu1  ;;  %v375_v45 = vadd.f32 %v366_v39, %v365_v36 }
 0x16f   : > { %v363_v46 = vmul.f32 %v327_v43, %v327_v43  ;;  %v329_v47 = vpop.f32.mrb[3].mxu0  ;;  %v367_v48 = vmul.f32 %v339_v44, %v339_v44  ;;  %v341_v49 = vpop.f32.mrb[3].mxu1 }
 0x170   : > { %370 = vadd.xlane.f32.xlu1 %v369_v42  ;;  %v347_v50 = vadd.f32 %v329_v47, %v327_v43  ;;  %v364_v51 = vmul.f32 %v329_v47, %v329_v47  ;;  %v353_v52 = vadd.f32 %v341_v49, %v339_v44  ;;  %v368_v53 = vmul.f32 %v341_v49, %v341_v49 }
 0x172   : > { %351 = vadd.xlane.f32.xlu0 %v350_v41  ;;  %v372_v54 = vadd.f32 %v364_v51, %v363_v46  ;;  %v378_v55 = vadd.f32 %v368_v53, %v367_v48 }
 0x174   : > { %348 = vadd.xlane.f32.xlu1 %v347_v50 }
 0x176   : > { %354 = vadd.xlane.f32.xlu0 %v353_v52 }
 0x178   : > { %376 = vadd.xlane.f32.xlu1 %v375_v45 }
 0x17a   : > { %373 = vadd.xlane.f32.xlu0 %v372_v54 }
 0x17e   : > { %379 = vadd.xlane.f32.xlu0 %v378_v55 }
 0x1fb   : > { %v346_v56 = vpop.xlane.xlu0 %345 }
 0x1fc   : > { %357 = vst.msk [vmem:[%s197_s13] sm:$0xff] %vm356_vm1, %v346_v56 }
 0x1fd   : > { %v371_v57 = vpop.xlane.xlu1 %370 }
 0x1fe   : > { %382 = vst.msk [vmem:[%s197_s13] sm:$0xff] %vm381_vm2, %v371_v57 }
 0x1ff   : > { %v352_v58 = vpop.xlane.xlu0 %351 }
 0x200   : > { %359 = vst.msk [vmem:[%s197_s13 + $0x10] sm:$0xff] %vm356_vm1, %v352_v58 }
 0x201   : > { %v349_v59 = vpop.xlane.xlu1 %348 }
 0x202   : > { %358 = vst.msk [vmem:[%s197_s13 + $0x8] sm:$0xff] %vm356_vm1, %v349_v59 }
 0x203   : > { %v355_v60 = vpop.xlane.xlu0 %354 }
 0x204   : > { %360 = vst.msk [vmem:[%s197_s13 + $0x18] sm:$0xff] %vm356_vm1, %v355_v60 }
 0x205   : > { %v377_v61 = vpop.xlane.xlu1 %376 }
 0x206   : > { %384 = vst.msk [vmem:[%s197_s13 + $0x10] sm:$0xff] %vm381_vm2, %v377_v61 }
 0x207   : > { %v374_v62 = vpop.xlane.xlu0 %373 }
 0x208   : > { %383 = vst.msk [vmem:[%s197_s13 + $0x8] sm:$0xff] %vm381_vm2, %v374_v62 }
 0x20b   : > { %v380_v63 = vpop.xlane.xlu0 %379 }
 0x20c   : > { %385 = vst.msk [vmem:[%s197_s13 + $0x18] sm:$0xff] %vm381_vm2, %v380_v63 }
 0x20d PF: > { %s14_s15 = sadd.s32 1, %s482_s15  }
 0x20e   : > { %p11_p4 = scmp.ge.s32.totalorder %s14_s15, 4  }
 0x210   :  { %13 = sbr.rel (!%p11_p4) target bundleno = 1 (0x1), region = 66 }

// kernel: bottleneck_forward.5
= control target key start
LH: loop header
LB: loop body
LE: loop exit
PB: predicated region body
PF: predicated region fallthrough
CT: control target
= control target key end

     0   :  { %s1432_s27 = smov 0   ;;  %s2070_s0 = inlined_call_operand.vmem [shape: f32[2,16,256], index: 0, kind: input, shape index: {}]   ;;  %s2071_s1 = inlined_call_operand.vmem [shape: f32[16,1], index: 1, kind: input, shape index: {}]   ;;  %s2072_s2 = inlined_call_operand.vmem [shape: f32[16,1], index: 2, kind: input, shape index: {}]   ;;  %s2073_s3 = inlined_call_operand.vmem [shape: f32[32,16], index: 3, kind: input, shape index: {}]   ;;  %s2074_s4 = inlined_call_operand.vmem [shape: f32[32,1], index: 4, kind: input, shape index: {}]   ;;  %s2075_s5 = inlined_call_operand.vmem [shape: f32[32,1], index: 5, kind: input, shape index: {}]   ;;  %s2076_s6 = inlined_call_operand.vmem [shape: f32[8,288], index: 6, kind: input, shape index: {}]   ;;  %s2077_s7 = inlined_call_operand.vmem [shape: f32[9,256], index: 7, kind: input, shape index: {}]   ;;  %s2078_s8 = inlined_call_operand.vmem [shape: f32[2,24,256], index: 8, kind: output, shape index: {}]  }
   0x1 LB: > { %s1247_s28 = sadd.s32 4294967295, %s1375_s27   ;;  %p1251_p0 = scmp.ge.s32.totalorder %s1375_s27, 1  ;;  %s1375_s27 = sphi %s1432_s27, %s18_s27  }
   0x2   : > { %p262_p1 = scmp.lt.s32.totalorder %s1375_s27, 3 }
   0x4   : > { %p263_p2 = pnand %p1251_p0, %p262_p1 }
   0x6   : > { %266 = sbr.rel (%p263_p2) target bundleno = 845 (0x34d), region = 52 }
   0xd   : > { %v326_v0 = vld [vmem:[%s2072_s2] sm:$0xff]  ;;  %p296_p3 = scmp.lt.s32.totalorder %s1247_s28, 1  ;;  %v1377_v2 = vmov 0   ;;  %v327_v3 = vld [vmem:[%s2072_s2 + $0x8] sm:$0xff]  ;;  %v455_v13 = vld [vmem:[%s2074_s4 + $0x18] sm:$0xff]  ;;  %v1378_v15 = vmov 0.0  }
   0xe   : > { %v310_v1 = vld [vmem:[%s2071_s1] sm:$0xff]  ;;  %1368 = vset.pattern.permute.xlu1 %v1377_v2  ;;  %1367 = vset.pattern.permute.xlu0 %v1377_v2  ;;  %v311_v4 = vld [vmem:[%s2071_s1 + $0x8] sm:$0xff]  ;;  %v454_v14 = vld [vmem:[%s2074_s4 + $0x10] sm:$0xff]  ;;  %vm350_vm0 = vcmask 130048   ;;  %s1380_s29 = smov 16   ;;  %s1381_s30 = smov 15  }
   0xf   : > { %330 = vperm.xlu1 %1368, %v326_v0   ;;  %314 = vperm.xlu0 %1367, %v310_v1   ;;  %s2100_s28 = smov (!%p296_p3, %s1247_s28), 1  ;;  %v453_v8 = vld [vmem:[%s2074_s4 + $0x8] sm:$0xff]  ;;  %v452_v9 = vld [vmem:[%s2074_s4] sm:$0xff]  ;;  %v487_v16 = vld [vmem:[%s2075_s5 + $0x18] sm:$0xff]  ;;  %s1382_s9 = smov 1   ;;  %vm1040_vm9 = vcmask 261120  }
  0x10   : > { %s1269_s15 = sshll.u32 %s2100_s28, 5  ;;  %s1348_s16 = smul.u32 48, %s2100_s28  ;;  %v485_v11 = vld [vmem:[%s2075_s5 + $0x8] sm:$0xff]  ;;  %v484_v12 = vld [vmem:[%s2075_s5] sm:$0xff]  ;;  %427 = vmatprep.mubr.f32.mxu0 %v1378_v15  ;;  %v486_v17 = vld [vmem:[%s2075_s5 + $0x10] sm:$0xff] }
  0x11   : > { %s300_s19 = scalar_lea.vmem %s2070_s0, %s1269_s15  ;;  %v346_v36 = vld [vmem:[%s2073_s3] sm:$0xff]  ;;  %v347_v37 = vld [vmem:[%s2073_s3 + $0x8] sm:$0xff]  ;;  %v348_v38 = vld [vmem:[%s2073_s3 + $0x10] sm:$0xff]  ;;  %s1379_s28 = smov 17  }
  0x12   : > { %s1458_s22 = scalar_lea.vmem %s2078_s8, %s1348_s16  ;;  %v306_v5 = vld [vmem:[%s300_s19] sm:$0xff]  ;;  %v307_v6 = vld [vmem:[%s300_s19 + $0x8] sm:$0xff]  ;;  %v308_v7 = vld [vmem:[%s300_s19 + $0x10] sm:$0xff]  ;;  %s1383_s10 = smov 127  }
  0x13   : > { %335 = vperm.xlu1 %1368, %v327_v3   ;;  %319 = vperm.xlu0 %1367, %v311_v4   ;;  %1186 = vst [vmem:[%s1458_s22] sm:$0xff] %v306_v5  ;;  %1187 = vst [vmem:[%s1458_s22 + $0x8] sm:$0xff] %v307_v6  ;;  %v309_v10 = vld [vmem:[%s300_s19 + $0x18] sm:$0xff]  ;;  %s1384_s11 = smov 113   ;;  %s1385_s12 = smov 112  }
  0x14   : > { %1188 = vst [vmem:[%s1458_s22 + $0x10] sm:$0xff] %v308_v7  ;;  %1189 = vst [vmem:[%s1458_s22 + $0x18] sm:$0xff] %v309_v10  ;;  %v349_v39 = vld [vmem:[%s2073_s3 + $0x18] sm:$0xff]  ;;  %s1386_s13 = smov 111  }
  0x17   : > { %463 = vperm.xlu1 %1368, %v453_v8   ;;  %458 = vperm.xlu0 %1367, %v452_v9  }
  0x1b   : > { %495 = vperm.xlu1 %1368, %v485_v11   ;;  %490 = vperm.xlu0 %1367, %v484_v12  }
  0x1f   : > { %473 = vperm.xlu1 %1368, %v455_v13   ;;  %468 = vperm.xlu0 %1367, %v454_v14  }
  0x23   : > { %505 = vperm.xlu1 %1368, %v487_v16   ;;  %500 = vperm.xlu0 %1367, %v486_v17  }
  0x8e   : > { %v331_v18 = vpop.permute.xlu1 %330  ;;  %v315_v19 = vpop.permute.xlu0 %314 }
  0x8f   : > { %v322_v20 = vmul.f32 %v315_v19, %v306_v5  ;;  %v323_v21 = vmul.f32 %v315_v19, %v307_v6  ;;  %v966_v19 = vld [vmem:[%s2076_s6 + $0x8] sm:$0xff] }
  0x90   : > { %1108 = vmatprep.mubr.f32.mxu1 %v966_v19 }
  0x91   : > { %v338_v23 = vadd.f32 %v331_v18, %v322_v20  ;;  %v339_v26 = vadd.f32 %v331_v18, %v323_v21 }
  0x92   : > { %v320_v22 = vpop.permute.xlu0 %319  ;;  %v336_v27 = vpop.permute.xlu1 %335 }
  0x93   : > { %v324_v24 = vmul.f32 %v320_v22, %v308_v7  ;;  %v325_v25 = vmul.f32 %v320_v22, %v309_v10  ;;  %v343_v30 = vmax.f32 %v339_v26, 0.0  ;;  %v342_v32 = vmax.f32 %v338_v23, 0.0 }
  0x95   : > { %v340_v28 = vadd.f32 %v336_v27, %v324_v24  ;;  %v341_v29 = vadd.f32 %v336_v27, %v325_v25  ;;  %v540_v24 = vlaneseq }
  0x96   : > { %v459_v40 = vpop.permute.xlu0 %458  ;;  %v464_v41 = vpop.permute.xlu1 %463 }
  0x97   : > { %v345_v31 = vmax.f32 %v341_v29, 0.0  ;;  %v344_v33 = vmax.f32 %v340_v28, 0.0  ;;  %v554_v27 = vshrl.u32 %v540_v24, 7 }
  0x99   : > { %v1270_v34 = vpack.c.bf16 %v345_v31, %v343_v30  ;;  %v1272_v35 = vpack.c.bf16 %v344_v33, %v342_v32  ;;  %v1641_v30 = vand.u32 127, %v540_v24  ;;  %v1643_v31 = vsub.s32 0, %v554_v27  ;;  %v551_v33 = vld [vmem:[%s2077_s7] ss:$8 sm:$0x3] }
  0x9a   : > { %v491_v45 = vpop.permute.xlu0 %490  ;;  %v496_v51 = vpop.permute.xlu1 %495  ;;  %v1645_v32 = vsub.s32 1, %v554_v27 }
  0x9b   : > { %1271 = vmatprep.subr.bf16.mxu0 %v1270_v34  ;;  %vm542_vm1 = vcmp.lt.s32.totalorder %v1641_v30, 17  ;;  %vm595_vm2 = vcmp.lt.s32.totalorder %v1641_v30, 16  ;;  %vm649_vm3 = vcmp.lt.s32.totalorder %v1641_v30, 15  ;;  %vm703_vm4 = vcmp.lt.s32.totalorder %v1641_v30, 1 }
  0x9c   : > { %1273 = vmatpush1.bf16.msra.mxu0 %v1272_v35  ;;  %vm765_vm5 = vcmp.lt.s32.totalorder %v1641_v30, 127  ;;  %vm819_vm6 = vcmp.lt.s32.totalorder %v1641_v30, 113  ;;  %vm927_vm7 = vcmp.lt.s32.totalorder %v1641_v30, 111  ;;  %vm873_vm8 = vcmp.lt.s32.totalorder %v1641_v30, 112  ;;  %v965_v30 = vld [vmem:[%s2076_s6] sm:$0xff] }
  0x9e   : > { %v469_v0 = vpop.permute.xlu0 %468  ;;  %v474_v2 = vpop.permute.xlu1 %473 }
  0x9f   : > { %1255 = vmatmul.mubr.msk.f32.vlgmr.msra.gmra.mrb[0].mxu0 %vm350_vm0, %v346_v36  ;;  %v1654_v36 = vrot.slane %v551_v33, %v1643_v31 }
  0xa0   : > { %433 = vmatprep.mubr.f32.mxu0 %v1378_v15 }
  0xa2   : > { %v501_v3 = vpop.permute.xlu0 %500  ;;  %v506_v6 = vpop.permute.xlu1 %505 }
  0xa3   : > { %1256 = vmatmul.mubr.msk.f32.gmra.mrb[2].mxu0 %vm350_vm0, %v347_v37  ;;  %v1259_v37 = vld [vmem:[%s2077_s7 + $0x1] ss:$8 sm:$0x3] }
  0xa4   : > { %439 = vmatprep.mubr.f32.mxu0 %v1378_v15 }
  0xa7   : > { %1257 = vmatmul.mubr.msk.f32.gmra.mrb[4].mxu0 %vm350_vm0, %v348_v38  ;;  %v1660_v38 = vrot.slane %v551_v33, %v1645_v32 }
  0xa8   : > { %445 = vmatprep.mubr.f32.mxu0 %v1378_v15 }
  0xab   : > { %1258 = vmatmul.mubr.msk.f32.gmra.mrb[6].mxu0 %vm350_vm0, %v349_v39 }
  0xac   : > { %1179 = vmatprep.mubr.f32.mxu0 %v1378_v15 }
 0x172   : > { %v429_v42 = vpop.f32.mrb[0].mxu0 }
 0x173   : > { %v476_v43 = vmul.f32 %v459_v40, %v429_v42  ;;  %v431_v44 = vpop.f32.mrb[1].mxu0 }
 0x174   : > { %v477_v58 = vmul.f32 %v459_v40, %v431_v44  ;;  %v1671_v44 = vrot.slane %v1259_v37, %v1645_v32 }
 0x175   : > { %v508_v46 = vadd.f32 %v491_v45, %v476_v43  ;;  %v1668_v43 = vrot.slane %v1259_v37, %v1643_v31 }
 0x176   : > { %v435_v47 = vpop.f32.mrb[2].mxu0  ;;  %v509_v59 = vadd.f32 %v491_v45, %v477_v58 }
 0x177   : > { %v1500_v48 = vmax.f32 %v508_v46, 0.0  ;;  %v478_v49 = vmul.f32 %v464_v41, %v435_v47  ;;  %v437_v50 = vpop.f32.mrb[3].mxu0 }
 0x178   : > { %v479_v60 = vmul.f32 %v464_v41, %v437_v50  ;;  %v1526_v61 = vmax.f32 %v509_v59, 0.0  ;;  %v1260_v50 = vld [vmem:[%s2077_s7 + $0x2] ss:$8 sm:$0x3] }
 0x179   : > { %v510_v52 = vadd.f32 %v496_v51, %v478_v49  ;;  %524 = vrot.lane.b32.xlu0 %v1500_v48, %s1379_s28 }
 0x17a   : > { %v441_v53 = vpop.f32.mrb[4].mxu0  ;;  %v511_v62 = vadd.f32 %v496_v51, %v479_v60  ;;  %v1690_v60 = vrot.slane %v1260_v50, %v1643_v31 }
 0x17b   : > { %v1504_v54 = vmax.f32 %v510_v52, 0.0  ;;  %v443_v55 = vpop.f32.mrb[5].mxu0  ;;  %v480_v1 = vmul.f32 %v469_v0, %v441_v53 }
 0x17c   : > { %v1532_v63 = vmax.f32 %v511_v62, 0.0  ;;  %v481_v10 = vmul.f32 %v469_v0, %v443_v55  ;;  %v1693_v62 = vrot.slane %v1260_v50, %v1645_v32 }
 0x17d   : > { %579 = vrot.lane.b32.xlu0 %v1500_v48, %s1380_s29  ;;  %526 = vrot.lane.b32.xlu1 %v1504_v54, %s1379_s28  ;;  %v512_v4 = vadd.f32 %v501_v3, %v480_v1 }
 0x17e   : > { %v447_v56 = vpop.f32.mrb[6].mxu0  ;;  %v513_v11 = vadd.f32 %v501_v3, %v481_v10 }
 0x17f   : > { %v449_v57 = vpop.f32.mrb[7].mxu0  ;;  %v482_v5 = vmul.f32 %v474_v2, %v447_v56  ;;  %v1554_v7 = vmax.f32 %v512_v4, 0.0 }
 0x180   : > { %v483_v12 = vmul.f32 %v474_v2, %v449_v57  ;;  %v1578_v13 = vmax.f32 %v513_v11, 0.0  ;;  %v1261_v2 = vld [vmem:[%s2077_s7 + $0x3] ss:$8 sm:$0x3] }
 0x181   : > { %633 = vrot.lane.b32.xlu0 %v1500_v48, %s1381_s30  ;;  %581 = vrot.lane.b32.xlu1 %v1504_v54, %s1380_s29  ;;  %v514_v8 = vadd.f32 %v506_v6, %v482_v5  ;;  %v1720_v11 = vrot.slane %v1261_v2, %v1643_v31  ;;  %v1730_v19 = vrot.slane %v1261_v2, %v1645_v32 }
 0x182   : > { %v515_v14 = vadd.f32 %v506_v6, %v483_v12 }
 0x183   : > { %v1560_v9 = vmax.f32 %v514_v8, 0.0 }
 0x184   : > { %v1584_v15 = vmax.f32 %v515_v14, 0.0 }
 0x185   : > { %687 = vrot.lane.b32.xlu0 %v1500_v48, %s1382_s9  ;;  %635 = vrot.lane.b32.xlu1 %v1504_v54, %s1381_s30 }
 0x189   : > { %749 = vrot.lane.b32.xlu0 %v1500_v48, %s1383_s10  ;;  %689 = vrot.lane.b32.xlu1 %v1504_v54, %s1382_s9 }
 0x18d   : > { %803 = vrot.lane.b32.xlu0 %v1500_v48, %s1384_s11  ;;  %751 = vrot.lane.b32.xlu1 %v1504_v54, %s1383_s10 }
 0x191   : > { %532 = vrot.lane.b32.xlu0 %v1526_v61, %s1379_s28  ;;  %805 = vrot.lane.b32.xlu1 %v1504_v54, %s1384_s11 }
 0x195   : > { %587 = vrot.lane.b32.xlu0 %v1526_v61, %s1380_s29  ;;  %534 = vrot.lane.b32.xlu1 %v1532_v63, %s1379_s28 }
 0x199   : > { %641 = vrot.lane.b32.xlu0 %v1526_v61, %s1381_s30  ;;  %589 = vrot.lane.b32.xlu1 %v1532_v63, %s1380_s29 }
 0x19d   : > { %695 = vrot.lane.b32.xlu0 %v1526_v61, %s1382_s9  ;;  %643 = vrot.lane.b32.xlu1 %v1532_v63, %s1381_s30 }
 0x1a1   : > { %757 = vrot.lane.b32.xlu0 %v1526_v61, %s1383_s10  ;;  %697 = vrot.lane.b32.xlu1 %v1532_v63, %s1382_s9 }
 0x1a5   : > { %811 = vrot.lane.b32.xlu0 %v1526_v61, %s1384_s11  ;;  %759 = vrot.lane.b32.xlu1 %v1532_v63, %s1383_s10 }
 0x1a9   : > { %813 = vrot.lane.b32.xlu1 %v1532_v63, %s1384_s11  ;;  %528 = vrot.lane.b32.xlu0 %v1554_v7, %s1379_s28 }
 0x1ad   : > { %583 = vrot.lane.b32.xlu0 %v1554_v7, %s1380_s29  ;;  %530 = vrot.lane.b32.xlu1 %v1560_v9, %s1379_s28 }
 0x1b1   : > { %637 = vrot.lane.b32.xlu0 %v1554_v7, %s1381_s30  ;;  %585 = vrot.lane.b32.xlu1 %v1560_v9, %s1380_s29 }
 0x1b5   : > { %691 = vrot.lane.b32.xlu0 %v1554_v7, %s1382_s9  ;;  %639 = vrot.lane.b32.xlu1 %v1560_v9, %s1381_s30 }
 0x1b9   : > { %753 = vrot.lane.b32.xlu0 %v1554_v7, %s1383_s10  ;;  %693 = vrot.lane.b32.xlu1 %v1560_v9, %s1382_s9 }
 0x1bd   : > { %536 = vrot.lane.b32.xlu0 %v1578_v13, %s1379_s28  ;;  %755 = vrot.lane.b32.xlu1 %v1560_v9, %s1383_s10 }
 0x1c1   : > { %807 = vrot.lane.b32.xlu0 %v1554_v7, %s1384_s11  ;;  %538 = vrot.lane.b32.xlu1 %v1584_v15, %s1379_s28 }
 0x1c5   : > { %591 = vrot.lane.b32.xlu0 %v1578_v13, %s1380_s29  ;;  %809 = vrot.lane.b32.xlu1 %v1560_v9, %s1384_s11 }
 0x1c9   : > { %645 = vrot.lane.b32.xlu0 %v1578_v13, %s1381_s30  ;;  %593 = vrot.lane.b32.xlu1 %v1584_v15, %s1380_s29 }
 0x1cd   : > { %699 = vrot.lane.b32.xlu0 %v1578_v13, %s1382_s9  ;;  %859 = vrot.lane.b32.xlu1 %v1504_v54, %s1385_s12 }
 0x1d1   : > { %761 = vrot.lane.b32.xlu0 %v1578_v13, %s1383_s10  ;;  %647 = vrot.lane.b32.xlu1 %v1584_v15, %s1381_s30 }
 0x1d5   : > { %815 = vrot.lane.b32.xlu0 %v1578_v13, %s1384_s11  ;;  %867 = vrot.lane.b32.xlu1 %v1532_v63, %s1385_s12 }
 0x1d9   : > { %857 = vrot.lane.b32.xlu0 %v1500_v48, %s1385_s12  ;;  %701 = vrot.lane.b32.xlu1 %v1584_v15, %s1382_s9 }
 0x1dd   : > { %865 = vrot.lane.b32.xlu0 %v1526_v61, %s1385_s12  ;;  %913 = vrot.lane.b32.xlu1 %v1504_v54, %s1386_s13 }
 0x1e1   : > { %911 = vrot.lane.b32.xlu0 %v1500_v48, %s1386_s13  ;;  %921 = vrot.lane.b32.xlu1 %v1532_v63, %s1386_s13 }
 0x1e5   : > { %919 = vrot.lane.b32.xlu0 %v1526_v61, %s1386_s13  ;;  %863 = vrot.lane.b32.xlu1 %v1560_v9, %s1385_s12 }
 0x1e9   : > { %861 = vrot.lane.b32.xlu0 %v1554_v7, %s1385_s12  ;;  %763 = vrot.lane.b32.xlu1 %v1584_v15, %s1383_s10 }
 0x1eb   : > { %v525_v16 = vpop.permute.xlu0 %524 }
 0x1ed   : > { %869 = vrot.lane.b32.xlu0 %v1578_v13, %s1385_s12  ;;  %917 = vrot.lane.b32.xlu1 %v1560_v9, %s1386_s13 }
 0x1ef   : > { %v580_v17 = vpop.permute.xlu0 %579  ;;  %v527_v18 = vpop.permute.xlu1 %526 }
 0x1f1   : > { %915 = vrot.lane.b32.xlu0 %v1554_v7, %s1386_s13  ;;  %817 = vrot.lane.b32.xlu1 %v1584_v15, %s1384_s11 }
 0x1f3   : > { %v634_v20 = vpop.permute.xlu0 %633  ;;  %v582_v21 = vpop.permute.xlu1 %581 }
 0x1f5   : > { %923 = vrot.lane.b32.xlu0 %v1578_v13, %s1386_s13  ;;  %871 = vrot.lane.b32.xlu1 %v1584_v15, %s1385_s12 }
 0x1f7   : > { %v1630_v22 = vpop.permute.xlu0 %687  ;;  %v636_v23 = vpop.permute.xlu1 %635 }
 0x1f9   : > { %925 = vrot.lane.b32.xlu1 %v1584_v15, %s1386_s13 }
 0x1fb   : > { %v1633_v25 = vpop.permute.xlu0 %749  ;;  %v1635_v26 = vpop.permute.xlu1 %689 }
 0x1ff   : > { %v1637_v28 = vpop.permute.xlu0 %803  ;;  %v1639_v29 = vpop.permute.xlu1 %751 }
 0x203   : > { %v533_v34 = vpop.permute.xlu0 %532  ;;  %v1651_v35 = vpop.permute.xlu1 %805 }
 0x204   : > { %v543_v39 = vsel %vm542_vm1, %v525_v16, %v533_v34  ;;  %v547_v40 = vsel %vm542_vm1, %v533_v34, %v525_v16  ;;  %v1262_v16 = vld [vmem:[%s2077_s7 + $0x5] ss:$8 sm:$0x3] }
 0x205   : > { %v563_v47 = vmul.f32 %v1654_v36, %v547_v40  ;;  %v564_v51 = vmul.f32 %v1660_v38, %v543_v39  ;;  %v1756_v39 = vrot.slane %v1262_v16, %v1643_v31  ;;  %v1759_v40 = vrot.slane %v1262_v16, %v1645_v32 }
 0x207   : > { %v588_v41 = vpop.permute.xlu0 %587  ;;  %v535_v42 = vpop.permute.xlu1 %534 }
 0x208   : > { %v544_v45 = vsel %vm542_vm1, %v527_v18, %v535_v42  ;;  %v548_v46 = vsel %vm542_vm1, %v535_v42, %v527_v18  ;;  %v596_v53 = vsel %vm595_vm2, %v580_v17, %v588_v41  ;;  %v600_v55 = vsel %vm595_vm2, %v588_v41, %v580_v17 }
 0x209   : > { %v565_v49 = vmul.f32 %v1654_v36, %v548_v46  ;;  %v566_v52 = vmul.f32 %v1660_v38, %v544_v45  ;;  %v1703_v3 = vmul.f32 %v1668_v43, %v600_v55  ;;  %v1706_v4 = vmul.f32 %v1671_v44, %v596_v53 }
 0x20b   : > { %v642_v56 = vpop.permute.xlu0 %641  ;;  %v590_v57 = vpop.permute.xlu1 %589  ;;  %v1274_v58 = vpack.c.bf16 %v566_v52, %v564_v51  ;;  %v1276_v59 = vpack.c.bf16 %v565_v49, %v563_v47  ;;  %v1263_v51 = vld [vmem:[%s2077_s7 + $0x6] ss:$8 sm:$0x3] }
 0x20c   : > { %v597_v0 = vsel %vm595_vm2, %v582_v21, %v590_v57  ;;  %v601_v1 = vsel %vm595_vm2, %v590_v57, %v582_v21  ;;  %v650_v8 = vsel %vm649_vm3, %v634_v20, %v642_v56  ;;  %v654_v10 = vsel %vm649_vm3, %v642_v56, %v634_v20 }
 0x20d   : > { %v1709_v5 = vmul.f32 %v1668_v43, %v601_v1  ;;  %v1712_v6 = vmul.f32 %v1671_v44, %v597_v0  ;;  %1275 = vmatprep.subr.bf16.mxu1 %v1274_v58  ;;  %v1738_v24 = vmul.f32 %v1690_v60, %v654_v10  ;;  %v1741_v27 = vmul.f32 %v1693_v62, %v650_v8 }
 0x20e   : > { %1277 = vmatpush1.bf16.msra.mxu1 %v1276_v59  ;;  %v1794_v56 = vrot.slane %v1263_v51, %v1643_v31 }
 0x20f   : > { %v696_v12 = vpop.permute.xlu0 %695  ;;  %v644_v14 = vpop.permute.xlu1 %643 }
 0x210   : > { %v651_v20 = vsel %vm649_vm3, %v636_v23, %v644_v14  ;;  %v655_v21 = vsel %vm649_vm3, %v644_v14, %v636_v23  ;;  %v704_v37 = vsel %vm703_vm4, %v1630_v22, %v696_v12  ;;  %v708_v23 = vsel %vm703_vm4, %v696_v12, %v1630_v22 }
 0x211   : > { %v1744_v33 = vmul.f32 %v1690_v60, %v655_v21  ;;  %v1747_v34 = vmul.f32 %v1693_v62, %v651_v20  ;;  %v1782_v52 = vmul.f32 %v1720_v11, %v708_v23  ;;  %v1785_v53 = vmul.f32 %v1730_v19, %v704_v37 }
 0x213   : > { %v758_v41 = vpop.permute.xlu0 %757  ;;  %v698_v42 = vpop.permute.xlu1 %697 }
 0x214   : > { %v766_v22 = vsel %vm765_vm5, %v1633_v25, %v758_v41  ;;  %v770_v47 = vsel %vm765_vm5, %v758_v41, %v1633_v25  ;;  %v705_v49 = vsel %vm703_vm4, %v1635_v26, %v698_v42  ;;  %v709_v50 = vsel %vm703_vm4, %v698_v42, %v1635_v26 }
 0x215   : > { %v1788_v25 = vmul.f32 %v1720_v11, %v709_v50  ;;  %v1791_v55 = vmul.f32 %v1730_v19, %v705_v49  ;;  %v1797_v26 = vrot.slane %v1263_v51, %v1645_v32  ;;  %v1816_v12 = vmul.f32 %v1756_v39, %v766_v22 }
 0x216   : > { %v1819_v14 = vmul.f32 %v1759_v40, %v770_v47 }
 0x217   : > { %2083 = vst [vmem:[#allocation3_spill] sm:$0xff] %v1797_v26  ;;  %v812_v57 = vpop.permute.xlu0 %811  ;;  %v760_v58 = vpop.permute.xlu1 %759 }
 0x218   : > { %v820_v1 = vsel %vm819_vm6, %v1637_v28, %v812_v57  ;;  %v824_v2 = vsel %vm819_vm6, %v812_v57, %v1637_v28  ;;  %v767_v8 = vsel %vm765_vm5, %v1639_v29, %v760_v58  ;;  %v771_v10 = vsel %vm765_vm5, %v760_v58, %v1639_v29 }
 0x219   : > { %v1822_v16 = vmul.f32 %v1756_v39, %v767_v8  ;;  %v1825_v20 = vmul.f32 %v1759_v40, %v771_v10  ;;  %v1838_v42 = vmul.f32 %v1794_v56, %v820_v1  ;;  %v1841_v22 = vmul.f32 %v1797_v26, %v824_v2 }
 0x21b   : > { %v814_v28 = vpop.permute.xlu1 %813  ;;  %v529_v21 = vpop.permute.xlu0 %528  ;;  %2084 = vst [vmem:[#allocation4_spill] sm:$0xff] %v1838_v42 }
 0x21c   : > { %v821_v23 = vsel %vm819_vm6, %v1651_v35, %v814_v28  ;;  %v825_v41 = vsel %vm819_vm6, %v814_v28, %v1651_v35 }
 0x21d   : > { %v1844_v47 = vmul.f32 %v1794_v56, %v821_v23  ;;  %v1847_v49 = vmul.f32 %v1797_v26, %v825_v41 }
 0x21f   : > { %2085 = vst [vmem:[#allocation5_spill] sm:$0xff] %v1844_v47  ;;  %v584_v50 = vpop.permute.xlu0 %583  ;;  %v531_v51 = vpop.permute.xlu1 %530 }
 0x223   : > { %v638_v58 = vpop.permute.xlu0 %637  ;;  %v586_v1 = vpop.permute.xlu1 %585 }
 0x227   : > { %v692_v8 = vpop.permute.xlu0 %691  ;;  %v640_v10 = vpop.permute.xlu1 %639 }
 0x22b   : > { %v1853_v2 = vpop.permute.xlu0 %753  ;;  %v694_v28 = vpop.permute.xlu1 %693 }
 0x22f   : > { %v537_v23 = vpop.permute.xlu0 %536  ;;  %v1855_v29 = vpop.permute.xlu1 %755 }
 0x230   : > { %v545_v41 = vsel %vm542_vm1, %v529_v21, %v537_v23  ;;  %v549_v37 = vsel %vm542_vm1, %v537_v23, %v529_v21 }
 0x231   : > { %v567_v46 = vmul.f32 %v1654_v36, %v549_v37  ;;  %v568_v45 = vmul.f32 %v1660_v38, %v545_v41 }
 0x233   : > { %v1861_v57 = vpop.permute.xlu0 %807  ;;  %v539_v0 = vpop.permute.xlu1 %538 }
 0x234   : > { %v546_v35 = vsel %vm542_vm1, %v531_v51, %v539_v0  ;;  %v550_v59 = vsel %vm542_vm1, %v539_v0, %v531_v51  ;;  %v2086_v51 = vpack.c.bf16 %v1712_v6, %v1706_v4 }
 0x235   : > { %v569_v18 = vmul.f32 %v1654_v36, %v550_v59  ;;  %v570_v17 = vmul.f32 %v1660_v38, %v546_v35 }
 0x237   : > { %v592_v42 = vpop.permute.xlu0 %591  ;;  %v1871_v47 = vpop.permute.xlu1 %809  ;;  %v1278_v21 = vpack.c.bf16 %v570_v17, %v568_v45  ;;  %v1280_v23 = vpack.c.bf16 %v569_v18, %v567_v46 }
 0x238   : > { %v598_v26 = vsel %vm595_vm2, %v584_v50, %v592_v42  ;;  %v602_v0 = vsel %vm595_vm2, %v592_v42, %v584_v50  ;;  %v2087_v42 = vpack.c.bf16 %v1709_v5, %v1703_v3 }
 0x239   : > { %1279 = vmatprep.subr.bf16.mxu1 %v1278_v21  ;;  %v621_v18 = vmul.f32 %v1668_v43, %v602_v0  ;;  %v622_v45 = vmul.f32 %v1671_v44, %v598_v26 }
 0x23a   : > { %1281 = vmatpush1.bf16.msra.mxu1 %v1280_v23 }
 0x23b   : > { %v646_v37 = vpop.permute.xlu0 %645  ;;  %1283 = vmatprep.subr.bf16.mxu1 %v2086_v51  ;;  %v594_v36 = vpop.permute.xlu1 %593 }
 0x23c   : > { %v599_v38 = vsel %vm595_vm2, %v586_v1, %v594_v36  ;;  %v603_v17 = vsel %vm595_vm2, %v594_v36, %v586_v1  ;;  %v652_v1 = vsel %vm649_vm3, %v638_v58, %v646_v37  ;;  %v656_v26 = vsel %vm649_vm3, %v646_v37, %v638_v58 }
 0x23d   : > { %v623_v46 = vmul.f32 %v1668_v43, %v603_v17  ;;  %v624_v59 = vmul.f32 %v1671_v44, %v599_v38  ;;  %v2088_v44 = vpack.c.bf16 %v1747_v34, %v1741_v27  ;;  %v675_v21 = vmul.f32 %v1690_v60, %v656_v26 }
 0x23e   : > { %1285 = vmatpush1.bf16.msra.mxu1 %v2087_v42  ;;  %v676_v23 = vmul.f32 %v1693_v62, %v652_v1  ;;  %v2089_v37 = vpack.c.bf16 %v1744_v33, %v1738_v24 }
 0x23f   : > { %v700_v4 = vpop.permute.xlu0 %699  ;;  %v1891_v6 = vpop.permute.xlu1 %859  ;;  %v1286_v50 = vpack.c.bf16 %v624_v59, %v622_v45  ;;  %v1288_v35 = vpack.c.bf16 %v623_v46, %v621_v18  ;;  %v2091_v59 = vpack.c.bf16 %v1788_v25, %v1782_v52  ;;  %v1308_v52 = vpack.c.bf16 %v1504_v54, %v1500_v48 }
 0x240   : > { %v710_v38 = vsel %vm703_vm4, %v700_v4, %v692_v8 }
 0x241   : > { %1287 = vmatprep.subr.bf16.mxu1 %v1286_v50  ;;  %v729_v18 = vmul.f32 %v1720_v11, %v710_v38 }
 0x242   : > { %1289 = vmatpush1.bf16.msra.mxu1 %v1288_v35 }
 0x243   : > { %v762_v43 = vpop.permute.xlu0 %761  ;;  %1291 = vmatprep.subr.bf16.mxu1 %v2088_v44  ;;  %v648_v3 = vpop.permute.xlu1 %647 }
 0x244   : > { %v653_v5 = vsel %vm649_vm3, %v640_v10, %v648_v3  ;;  %v657_v41 = vsel %vm649_vm3, %v648_v3, %v640_v10  ;;  %v706_v10 = vsel %vm703_vm4, %v692_v8, %v700_v4 }
 0x245   : > { %v677_v0 = vmul.f32 %v1690_v60, %v657_v41  ;;  %v678_v58 = vmul.f32 %v1693_v62, %v653_v5  ;;  %v2090_v62 = vpack.c.bf16 %v1791_v55, %v1785_v53  ;;  %v730_v45 = vmul.f32 %v1730_v19, %v706_v10 }
 0x246   : > { %1293 = vmatpush1.bf16.msra.mxu1 %v2089_v37 }
 0x247   : > { %v1911_v27 = vpop.permute.xlu0 %815  ;;  %v1913_v34 = vpop.permute.xlu1 %867  ;;  %v1294_v51 = vpack.c.bf16 %v678_v58, %v676_v23  ;;  %v1296_v36 = vpack.c.bf16 %v677_v0, %v675_v21  ;;  %v768_v21 = vsel %vm765_vm5, %v1853_v2, %v762_v43  ;;  %v772_v23 = vsel %vm765_vm5, %v762_v43, %v1853_v2 }
 0x248   : > { %v791_v10 = vmul.f32 %v1756_v39, %v768_v21  ;;  %v792_v2 = vmul.f32 %v1759_v40, %v772_v23 }
 0x249   : > { %1295 = vmatprep.subr.bf16.mxu1 %v1294_v51 }
 0x24a   : > { %1297 = vmatpush1.bf16.msra.mxu1 %v1296_v36 }
 0x24b   : > { %v1919_v60 = vpop.permute.xlu0 %857  ;;  %1299 = vmatprep.subr.bf16.mxu1 %v2090_v62  ;;  %v702_v24 = vpop.permute.xlu1 %701 }
 0x24c   : > { %v707_v33 = vsel %vm703_vm4, %v694_v28, %v702_v24  ;;  %v711_v17 = vsel %vm703_vm4, %v702_v24, %v694_v28  ;;  %v1306_v28 = vpack.c.bf16 %v1532_v63, %v1526_v61  ;;  %v1310_v61 = vpack.c.bf16 %v1584_v15, %v1578_v13 }
 0x24d   : > { %v731_v8 = vmul.f32 %v1720_v11, %v711_v17  ;;  %v732_v46 = vmul.f32 %v1730_v19, %v707_v33  ;;  %v1265_v11 = vld [vmem:[%s2077_s7 + $0x10] ss:$8 sm:$0x3]  ;;  %v1312_v13 = vpack.c.bf16 %v1560_v9, %v1554_v7  ;;  %v2092_v9 = vpack.c.bf16 %v1825_v20, %v1819_v14 }
 0x24e   : > { %1301 = vmatpush1.bf16.msra.mxu1 %v2091_v59  ;;  %v1946_v25 = vrot.slane %v1265_v11, %v1643_v31  ;;  %v1949_v35 = vrot.slane %v1265_v11, %v1645_v32  ;;  %v2093_v14 = vpack.c.bf16 %v1822_v16, %v1816_v12 }
 0x24f   : > { %v1935_v53 = vpop.permute.xlu0 %865  ;;  %v914_v55 = vpop.permute.xlu1 %913  ;;  %v1302_v42 = vpack.c.bf16 %v732_v46, %v730_v45  ;;  %v1304_v4 = vpack.c.bf16 %v731_v8, %v729_v18  ;;  %v875_v18 = vsel %vm873_vm8, %v1891_v6, %v1913_v34  ;;  %v2094_v8 = vpack.c.bf16 %v1847_v49, %v1841_v22 }
 0x250   : > { %v878_v12 = vsel %vm873_vm8, %v1935_v53, %v1919_v60 }
 0x251   : > { %1303 = vmatprep.subr.bf16.mxu1 %v1302_v42  ;;  %v2096_v42 = vld [vmem:[#allocation5_spill] sm:$0xff] }
 0x252   : > { %1305 = vmatpush1.bf16.msra.mxu1 %v1304_v4  ;;  %v2097_v4 = vld [vmem:[#allocation4_spill] sm:$0xff] }
 0x253   : > { %v912_v50 = vpop.permute.xlu0 %911  ;;  %1307 = vmatprep.subr.bf16.mxu1 %v1306_v28  ;;  %v922_v19 = vpop.permute.xlu1 %921  ;;  %v2098_v28 = vpack.c.bf16 %v2096_v42, %v2097_v4 }
 0x254   : > { %v929_v63 = vsel %vm927_vm7, %v914_v55, %v922_v19  ;;  %v933_v1 = vsel %vm927_vm7, %v922_v19, %v914_v55 }
 0x255   : > { %v951_v15 = vmul.f32 %v1946_v25, %v929_v63  ;;  %v952_v3 = vmul.f32 %v1949_v35, %v933_v1 }
 0x256   : > { %1309 = vmatpush1.bf16.msra.mxu1 %v1308_v52 }
 0x257   : > { %v920_v26 = vpop.permute.xlu0 %919  ;;  %v1957_v44 = vpop.permute.xlu1 %863  ;;  %1311 = vmatprep.subr.bf16.mxu1 %v1310_v61 }
 0x258   : > { %v928_v48 = vsel %vm927_vm7, %v912_v50, %v920_v26  ;;  %v932_v54 = vsel %vm927_vm7, %v920_v26, %v912_v50 }
 0x259   : > { %v949_v5 = vmul.f32 %v1946_v25, %v928_v48  ;;  %v950_v41 = vmul.f32 %v1949_v35, %v932_v54 }
 0x25a   : > { %1313 = vmatpush1.bf16.msra.mxu1 %v1312_v13 }
 0x25b   : > { %v1340_v0 = vpack.c.bf16 %v951_v15, %v949_v5  ;;  %v862_v58 = vpop.permute.xlu0 %861  ;;  %v764_v7 = vpop.permute.xlu1 %763  ;;  %1315 = vmatprep.subr.bf16.mxu1 %v2092_v9  ;;  %v1338_v37 = vpack.c.bf16 %v952_v3, %v950_v41 }
 0x25c   : > { %v769_v51 = vsel %vm765_vm5, %v1855_v29, %v764_v7  ;;  %v773_v36 = vsel %vm765_vm5, %v764_v7, %v1855_v29  ;;  %v1264_v29 = vld [vmem:[%s2077_s7 + $0x7] ss:$8 sm:$0x3] }
 0x25d   : > { %v793_v43 = vmul.f32 %v1756_v39, %v769_v51  ;;  %v794_v38 = vmul.f32 %v1759_v40, %v773_v36  ;;  %1339 = vmatprep.subr.bf16.mxu0 %v1338_v37  ;;  %v822_v39 = vsel %vm819_vm6, %v1861_v57, %v1911_v27  ;;  %v826_v40 = vsel %vm819_vm6, %v1911_v27, %v1861_v57 }
 0x25e   : > { %1317 = vmatpush1.bf16.msra.mxu1 %v2093_v14  ;;  %1341 = vmatpush1.bf16.msra.mxu0 %v1340_v0  ;;  %v888_v16 = vrot.slane %v1264_v29, %v1643_v31  ;;  %v892_v17 = vrot.slane %v1264_v29, %v1645_v32  ;;  %v879_v57 = vsel %vm873_vm8, %v1913_v34, %v1891_v6  ;;  %v2095_v34 = vld [vmem:[#allocation3_spill] sm:$0xff] }
 0x25f   : > { %v870_v20 = vpop.permute.xlu0 %869  ;;  %v918_v62 = vpop.permute.xlu1 %917  ;;  %v1318_v24 = vpack.c.bf16 %v794_v38, %v792_v2  ;;  %v1320_v33 = vpack.c.bf16 %v793_v43, %v791_v10  ;;  %v845_v31 = vmul.f32 %v1794_v56, %v822_v39  ;;  %v874_v32 = vsel %vm873_vm8, %v1919_v60, %v1935_v53 }
 0x260   : > { %v846_v59 = vmul.f32 %v2095_v34, %v826_v40  ;;  %v896_v55 = vmul.f32 %v892_v17, %v878_v12  ;;  %v898_v60 = vmul.f32 %v892_v17, %v879_v57  ;;  %v895_v53 = vmul.f32 %v888_v16, %v874_v32 }
 0x261   : > { %1319 = vmatprep.subr.bf16.mxu1 %v1318_v24  ;;  %v897_v61 = vmul.f32 %v888_v16, %v875_v18  ;;  %v876_v13 = vsel %vm873_vm8, %v862_v58, %v870_v20 }
 0x262   : > { %1321 = vmatpush1.bf16.msra.mxu1 %v1320_v33  ;;  %v1330_v48 = vpack.c.bf16 %v898_v60, %v896_v55  ;;  %v899_v37 = vmul.f32 %v888_v16, %v876_v13 }
 0x263   : > { %v916_v27 = vpop.permute.xlu0 %915  ;;  %v818_v45 = vpop.permute.xlu1 %817  ;;  %1323 = vmatprep.subr.bf16.mxu1 %v2094_v8  ;;  %v1332_v5 = vpack.c.bf16 %v897_v61, %v895_v53 }
 0x264   : > { %v823_v46 = vsel %vm819_vm6, %v1871_v47, %v818_v45  ;;  %v827_v6 = vsel %vm819_vm6, %v818_v45, %v1871_v47  ;;  %v880_v47 = vsel %vm873_vm8, %v870_v20, %v862_v58 }
 0x265   : > { %v847_v22 = vmul.f32 %v1794_v56, %v823_v46  ;;  %v848_v49 = vmul.f32 %v2095_v34, %v827_v6  ;;  %v900_v15 = vmul.f32 %v892_v17, %v880_v47 }
 0x266   : > { %1325 = vmatpush1.bf16.msra.mxu1 %v2098_v28 }
 0x267   : > { %v924_v11 = vpop.permute.xlu0 %923  ;;  %v872_v50 = vpop.permute.xlu1 %871  ;;  %v1326_v19 = vpack.c.bf16 %v848_v49, %v846_v59  ;;  %v1328_v52 = vpack.c.bf16 %v847_v22, %v845_v31 }
 0x268   : > { %v881_v56 = vsel %vm873_vm8, %v872_v50, %v1957_v44  ;;  %v930_v63 = vsel %vm927_vm7, %v916_v27, %v924_v11  ;;  %v877_v1 = vsel %vm873_vm8, %v1957_v44, %v872_v50  ;;  %v934_v54 = vsel %vm927_vm7, %v924_v11, %v916_v27 }
 0x269   : > { %v902_v26 = vmul.f32 %v892_v17, %v881_v56  ;;  %1327 = vmatprep.subr.bf16.mxu1 %v1326_v19  ;;  %v953_v41 = vmul.f32 %v1946_v25, %v930_v63  ;;  %v901_v21 = vmul.f32 %v888_v16, %v877_v1  ;;  %v954_v0 = vmul.f32 %v1949_v35, %v934_v54 }
 0x26a   : > { %1329 = vmatpush1.bf16.msra.mxu1 %v1328_v52 }
 0x26b   : > { %v926_v3 = vpop.permute.xlu1 %925  ;;  %1331 = vmatprep.subr.bf16.mxu1 %v1330_v48  ;;  %v1334_v58 = vpack.c.bf16 %v902_v26, %v900_v15  ;;  %v1336_v10 = vpack.c.bf16 %v901_v21, %v899_v37 }
 0x26c   : > { %v931_v44 = vsel %vm927_vm7, %v918_v62, %v926_v3  ;;  %v935_v23 = vsel %vm927_vm7, %v926_v3, %v918_v62 }
 0x26d   : > { %v955_v7 = vmul.f32 %v1946_v25, %v931_v44  ;;  %v956_v9 = vmul.f32 %v1949_v35, %v935_v23  ;;  %v967_v25 = vld [vmem:[%s2076_s6 + $0x10] sm:$0xff] }
 0x26e   : > { %1333 = vmatpush1.bf16.msra.mxu1 %v1332_v5 }
 0x26f   : > { %v1344_v51 = vpack.c.bf16 %v955_v7, %v953_v41  ;;  %1335 = vmatprep.subr.bf16.mxu1 %v1334_v58  ;;  %v1342_v36 = vpack.c.bf16 %v956_v9, %v954_v0 }
 0x271   : > { %1343 = vmatprep.subr.bf16.mxu0 %v1342_v36 }
 0x272   : > { %1337 = vmatpush1.bf16.msra.mxu1 %v1336_v10  ;;  %1345 = vmatpush1.bf16.msra.mxu0 %v1344_v51 }
 0x275   : > { %1109 = vmatmul.mubr.f32.vlgmr.msra.gmra.mrb[0].mxu1 %v965_v30  ;;  %1266 = vmatmul.mubr.msk.f32.vlgmr.msra.gmra.mrb[8].mxu0 %vm1040_vm9, %v967_v25 }
 0x348   : > { %v1110_v35 = vpop.f32.mrb[0].mxu1  ;;  %v1181_v2 = vpop.f32.mrb[8].mxu0 }
 0x349   : > { %v1182_v43 = vadd.f32 %v1181_v2, %v1110_v35  ;;  %v1112_v38 = vpop.f32.mrb[1].mxu1  ;;  %v1183_v14 = vpop.f32.mrb[9].mxu0 }
 0x34a   : > { %v1184_v20 = vadd.f32 %v1183_v14, %v1112_v38 }
 0x34b   : > { %1190 = vst [vmem:[%s1458_s22 + $0x20] sm:$0xff] %v1182_v43 }
 0x34c   : > { %1191 = vst [vmem:[%s1458_s22 + $0x28] sm:$0xff] %v1184_v20 }
 0x34d PF: > { %s18_s27 = sadd.s32 1, %s1375_s27  }
 0x34e   : > { %p15_p4 = scmp.ge.s32.totalorder %s18_s27, 4  }
 0x350   :  { %17 = sbr.rel (!%p15_p4) target bundleno = 1 (0x1), region = 89 }

</bundles_post_ra>
